<compile_context>
chip_gen: v6e
topology: v6e:2x2x1
jax: 0.10.0
libtpu: 0.0.40
codegen_flags: <defaults>
</compile_context>

<pallas_src>
import functools
import math

import numpy as np
import jax
import jax.numpy as jnp
from jax import lax
from jax.experimental import pallas as pl
from jax.experimental.pallas import tpu as pltpu


def _attention_layer_kernel(
    q_ref, k_ref, v_ref,
    wq_ref, bq_ref, wk_ref, bk_ref, wv_ref, bv_ref, wo_ref, bo_ref,
    out_ref, attn_ref,
    q_scr, k_scr, v_scr,
    *, n_heads, scale, approx_recip):
  compute_dtype = q_scr.dtype
  lt = pl.program_id(1)

  # ---- K/V projections: once per batch (first L-tile only), head-major scratch.
  # k_scr: (H, S, d_k), v_scr: (H, S, d_v). Leading-axis slices are free; the
  # scratch persists across all L-tiles of this batch.
  @pl.when(lt == 0)
  def _project_kv():
    k = k_ref[0].astype(compute_dtype)          # (S, d_model)
    v = v_ref[0].astype(compute_dtype)
    for h in range(n_heads):                    # small static H -> unrolled
      kh = jnp.dot(k, wk_ref[h], preferred_element_type=jnp.float32) + bk_ref[h]
      vh = jnp.dot(v, wv_ref[h], preferred_element_type=jnp.float32) + bv_ref[h]
      k_scr[h] = kh.astype(compute_dtype)
      v_scr[h] = vh.astype(compute_dtype)

  # ---- Q projection for this L-tile, head-major: q_scr (H, TL, d_k).
  q = q_ref[0].astype(compute_dtype)            # (TL, d_model)
  for h in range(n_heads):
    qh = jnp.dot(q, wq_ref[h], preferred_element_type=jnp.float32) + bq_ref[h]
    q_scr[h] = qh.astype(compute_dtype)

  # ---- Scores + softmax, batched over heads (no K transpose, no lane slices).
  # (H, TL, S) = contract last dims of (H, TL, d_k) and (H, S, d_k).
  scores = lax.dot_general(
      q_scr[...], k_scr[...],
      dimension_numbers=(((2,), (2,)), ((0,), (0,))),
      preferred_element_type=jnp.float32) * scale
  m = jnp.max(scores, axis=-1, keepdims=True)
  e = jnp.exp(scores - m)
  denom = jnp.sum(e, axis=-1, keepdims=True)
  attn = e * pl.reciprocal(denom, approx=approx_recip)     # (H, TL, S) f32

  attn_ref[0] = attn.astype(attn_ref.dtype)

  # ---- A @ V, batched over heads: (H, TL, d_v).
  o_h = lax.dot_general(
      attn.astype(compute_dtype), v_scr[...],
      dimension_numbers=(((2,), (1,)), ((0,), (0,))),
      preferred_element_type=jnp.float32)
  o_h = o_h.astype(compute_dtype)

  # ---- Output projection: per-head accumulation (no lane-dim concat).
  out = jnp.dot(o_h[0], wo_ref[0], preferred_element_type=jnp.float32)
  for h in range(1, n_heads):
    out = out + jnp.dot(o_h[h], wo_ref[h], preferred_element_type=jnp.float32)
  out_ref[0] = (out + bo_ref[...]).astype(out_ref.dtype)


def attention_layer_pallas(queries, keys, values, params, n_heads, *,
                           l_tile=256,               # multiple of 128/256 for v5e/v6e MXU
                           compute_dtype=jnp.bfloat16,
                           attn_dtype=jnp.bfloat16,
                           approx_recip=True,
                           vmem_limit_bytes=64 * 1024 * 1024):
  """Forward pass of AttentionLayer (unmasked FullAttention inner attention)."""
  B, L, d_model = queries.shape
  _, S, _ = keys.shape
  H = n_heads
  d_k = params["wq"].shape[0] // H
  d_v = params["wv"].shape[0] // H
  d_out = params["wo"].shape[0]
  scale = 1.0 / math.sqrt(d_k)

  TL = min(l_tile, L)
  num_l_tiles = pl.cdiv(L, TL)

  # PyTorch Linear weights are (out_features, in_features). Pre-reshape host-side
  # to head-major, matmul-ready blocks and cast MXU weight operands to bf16
  # (f32 accumulation is requested in-kernel via preferred_element_type).
  wq = jnp.transpose(params["wq"].reshape(H, d_k, d_model), (0, 2, 1)).astype(compute_dtype)
  wk = jnp.transpose(params["wk"].reshape(H, d_k, d_model), (0, 2, 1)).astype(compute_dtype)
  wv = jnp.transpose(params["wv"].reshape(H, d_v, d_model), (0, 2, 1)).astype(compute_dtype)
  wo = params["wo"].T.reshape(H, d_v, d_out).astype(compute_dtype)
  bq = params["bq"].reshape(H, 1, d_k).astype(jnp.float32)
  bk = params["bk"].reshape(H, 1, d_k).astype(jnp.float32)
  bv = params["bv"].reshape(H, 1, d_v).astype(jnp.float32)
  bo = params["bo"].reshape(1, d_out).astype(jnp.float32)

  kernel = functools.partial(_attention_layer_kernel, n_heads=H, scale=scale,
                             approx_recip=approx_recip)
  const3 = lambda b, l: (0, 0, 0)

  out, attn = pl.pallas_call(
      kernel,
      out_shape=(
          jax.ShapeDtypeStruct((B, L, d_out), jnp.float32),
          jax.ShapeDtypeStruct((B, H, L, S), attn_dtype),
      ),
      grid_spec=pltpu.PrefetchScalarGridSpec(
          num_scalar_prefetch=0,
          grid=(B, num_l_tiles),
          in_specs=[
              pl.BlockSpec((1, TL, d_model), lambda b, l: (b, l, 0)),   # queries (L-tiled)
              pl.BlockSpec((1, S, d_model), lambda b, l: (b, 0, 0)),    # keys (per batch)
              pl.BlockSpec((1, S, d_model), lambda b, l: (b, 0, 0)),    # values (per batch)
              # Weights / biases: constant block index -> fetched once, resident.
              pl.BlockSpec((H, d_model, d_k), const3),                  # Wq (head-major)
              pl.BlockSpec((H, 1, d_k), const3),                        # bq
              pl.BlockSpec((H, d_model, d_k), const3),                  # Wk
              pl.BlockSpec((H, 1, d_k), const3),                        # bk
              pl.BlockSpec((H, d_model, d_v), const3),                  # Wv
              pl.BlockSpec((H, 1, d_v), const3),                        # bv
              pl.BlockSpec((H, d_v, d_out), const3),                    # Wo (head-major)
              pl.BlockSpec((1, d_out), lambda b, l: (0, 0)),            # bo
          ],
          out_specs=[
              pl.BlockSpec((1, TL, d_out), lambda b, l: (b, l, 0)),     # output (L-tiled)
              pl.BlockSpec((1, H, TL, S), lambda b, l: (b, 0, l, 0)),   # attn weights (L-tiled)
          ],
          scratch_shapes=[
              pltpu.VMEM((H, TL, d_k), compute_dtype),   # Q, head-major (per L-tile)
              pltpu.VMEM((H, S, d_k), compute_dtype),    # K, head-major (per batch)
              pltpu.VMEM((H, S, d_v), compute_dtype),    # V, head-major (per batch)
          ],
      ),
      compiler_params=pltpu.CompilerParams(
          dimension_semantics=("parallel", "arbitrary"),
          vmem_limit_bytes=vmem_limit_bytes),
  )(queries, keys, values, wq, bq, wk, bk, wv, bv, wo, bo)
  return out, attn


def _reference(queries, keys, values, params, n_heads):
  """Pure-JAX reference mirroring the PyTorch forward."""
  B, L, d_model = queries.shape
  _, S, _ = keys.shape
  H = n_heads
  d_k = params["wq"].shape[0] // H
  d_v = params["wv"].shape[0] // H
  Q = (queries @ params["wq"].T + params["bq"]).reshape(B, L, H, d_k)
  K = (keys @ params["wk"].T + params["bk"]).reshape(B, S, H, d_k)
  V = (values @ params["wv"].T + params["bv"]).reshape(B, S, H, d_v)
  scale = 1.0 / math.sqrt(d_k)
  scores = jnp.einsum("blhe,bshe->bhls", Q, K)
  A = jax.nn.softmax(scale * scores, axis=-1)
  O = jnp.einsum("bhls,bshd->blhd", A, V).reshape(B, L, H * d_v)
  out = O @ params["wo"].T + params["bo"]
  return out, A


if __name__ == "__main__":
  B, L, S = 2, 8, 8
  d_model, n_heads = 32, 4
  d_k = d_model // n_heads
  d_v = d_model // n_heads

  key = jax.random.PRNGKey(0)
  ks = jax.random.split(key, 11)
  sc = 1.0 / math.sqrt(d_model)
  params = {
      "wq": jax.random.normal(ks[0], (d_k * n_heads, d_model), jnp.float32) * sc,
      "bq": jax.random.normal(ks[1], (d_k * n_heads,), jnp.float32) * 0.1,
      "wk": jax.random.normal(ks[2], (d_k * n_heads, d_model), jnp.float32) * sc,
      "bk": jax.random.normal(ks[3], (d_k * n_heads,), jnp.float32) * 0.1,
      "wv": jax.random.normal(ks[4], (d_v * n_heads, d_model), jnp.float32) * sc,
      "bv": jax.random.normal(ks[5], (d_v * n_heads,), jnp.float32) * 0.1,
      "wo": jax.random.normal(ks[6], (d_model, d_v * n_heads), jnp.float32) * sc,
      "bo": jax.random.normal(ks[7], (d_model,), jnp.float32) * 0.1,
  }
  queries = jax.random.normal(ks[8], (B, L, d_model), jnp.float32)
  keys_in = jax.random.normal(ks[9], (B, S, d_model), jnp.float32)
  values = jax.random.normal(ks[10], (B, S, d_model), jnp.float32)

  ref_out, ref_attn = _reference(queries, keys_in, values, params, n_heads)

  # Fast path (default): bf16 MXU operands, bf16 attn writeback, EUP reciprocal.
  out, attn = attention_layer_pallas(queries, keys_in, values, params, n_heads)
  out = jax.block_until_ready(out)
  attn = jax.block_until_ready(attn)
  np.testing.assert_allclose(np.asarray(out), np.asarray(ref_out),
                             rtol=5e-2, atol=5e-2)
  np.testing.assert_allclose(np.asarray(attn.astype(jnp.float32)), np.asarray(ref_attn),
                             rtol=5e-2, atol=5e-2)

  # Precise path: f32 MXU operands, f32 attn output, exact reciprocal.
  out32, attn32 = attention_layer_pallas(
      queries, keys_in, values, params, n_heads,
      compute_dtype=jnp.float32, attn_dtype=jnp.float32, approx_recip=False)
  out32 = jax.block_until_ready(out32)
  attn32 = jax.block_until_ready(attn32)
  np.testing.assert_allclose(np.asarray(out32), np.asarray(ref_out),
                             rtol=1e-4, atol=1e-4)
  np.testing.assert_allclose(np.asarray(attn32), np.asarray(ref_attn),
                             rtol=1e-4, atol=1e-4)

  print("KERNEL_OK")
</pallas_src>

<mosaic_0001>
module attributes {stable_mosaic.version = 11 : i64} {
  func.func @_attention_layer_kernel(%arg0: i32, %arg1: i32, %arg2: memref<1x8x32xf32, #tpu.memory_space<vmem>>, %arg3: memref<1x8x32xf32, #tpu.memory_space<vmem>>, %arg4: memref<1x8x32xf32, #tpu.memory_space<vmem>>, %arg5: memref<4x32x8xbf16, #tpu.memory_space<vmem>>, %arg6: memref<4x1x8xf32, #tpu.memory_space<vmem>>, %arg7: memref<4x32x8xbf16, #tpu.memory_space<vmem>>, %arg8: memref<4x1x8xf32, #tpu.memory_space<vmem>>, %arg9: memref<4x32x8xbf16, #tpu.memory_space<vmem>>, %arg10: memref<4x1x8xf32, #tpu.memory_space<vmem>>, %arg11: memref<4x8x32xbf16, #tpu.memory_space<vmem>>, %arg12: memref<1x32xf32, #tpu.memory_space<vmem>>, %arg13: memref<1x8x32xf32, #tpu.memory_space<vmem>>, %arg14: memref<1x4x8x8xbf16, #tpu.memory_space<vmem>>, %arg15: memref<4x8x8xbf16, #tpu.memory_space<vmem>>, %arg16: memref<4x8x8xbf16, #tpu.memory_space<vmem>>, %arg17: memref<4x8x8xbf16, #tpu.memory_space<vmem>>) attributes {dimension_semantics = [#tpu.dimension_semantics<parallel>, #tpu.dimension_semantics<arbitrary>], iteration_bounds = array<i64: 2, 1>, scalar_prefetch = 0 : i64, scratch_operands = 3 : i64, tpu.core_type = #tpu.core_type<tc>, window_params = [{transform_indices = @transform_0, window_bounds = array<i64: 1, 8, 32>}, {transform_indices = @transform_1, window_bounds = array<i64: 1, 8, 32>}, {transform_indices = @transform_2, window_bounds = array<i64: 1, 8, 32>}, {pipeline_mode = #tpu.pipeline_mode<synchronous>, transform_indices = @transform_3, window_bounds = array<i64: 4, 32, 8>}, {pipeline_mode = #tpu.pipeline_mode<synchronous>, transform_indices = @transform_4, window_bounds = array<i64: 4, 1, 8>}, {pipeline_mode = #tpu.pipeline_mode<synchronous>, transform_indices = @transform_5, window_bounds = array<i64: 4, 32, 8>}, {pipeline_mode = #tpu.pipeline_mode<synchronous>, transform_indices = @transform_6, window_bounds = array<i64: 4, 1, 8>}, {pipeline_mode = #tpu.pipeline_mode<synchronous>, transform_indices = @transform_7, window_bounds = array<i64: 4, 32, 8>}, {pipeline_mode = #tpu.pipeline_mode<synchronous>, transform_indices = @transform_8, window_bounds = array<i64: 4, 1, 8>}, {pipeline_mode = #tpu.pipeline_mode<synchronous>, transform_indices = @transform_9, window_bounds = array<i64: 4, 8, 32>}, {pipeline_mode = #tpu.pipeline_mode<synchronous>, transform_indices = @transform_10, window_bounds = array<i64: 1, 32>}, {transform_indices = @transform_11, window_bounds = array<i64: 1, 8, 32>}, {transform_indices = @transform_12, window_bounds = array<i64: 1, 4, 8, 8>}]} {
    %c0_i32 = arith.constant 0 : i32
    %0 = arith.cmpi eq, %arg1, %c0_i32 : i32
    %1 = arith.extui %0 : i1 to i32
    %c0_i32_0 = arith.constant 0 : i32
    %2 = arith.cmpi ne, %1, %c0_i32_0 : i32
    scf.if %2 {
      %c0_78 = arith.constant 0 : index
      %c0_79 = arith.constant 0 : index
      %c0_80 = arith.constant 0 : index
      %102 = vector.load %arg3[%c0_78, %c0_79, %c0_80] : memref<1x8x32xf32, #tpu.memory_space<vmem>>, vector<1x8x32xf32>
      %103 = vector.shape_cast %102 : vector<1x8x32xf32> to vector<8x32xf32>
      %104 = arith.truncf %103 : vector<8x32xf32> to vector<8x32xbf16>
      %c0_81 = arith.constant 0 : index
      %c0_82 = arith.constant 0 : index
      %c0_83 = arith.constant 0 : index
      %105 = vector.load %arg4[%c0_81, %c0_82, %c0_83] : memref<1x8x32xf32, #tpu.memory_space<vmem>>, vector<1x8x32xf32>
      %106 = vector.shape_cast %105 : vector<1x8x32xf32> to vector<8x32xf32>
      %107 = arith.truncf %106 : vector<8x32xf32> to vector<8x32xbf16>
      %c0_84 = arith.constant 0 : index
      %c0_85 = arith.constant 0 : index
      %c0_86 = arith.constant 0 : index
      %108 = vector.load %arg7[%c0_84, %c0_85, %c0_86] : memref<4x32x8xbf16, #tpu.memory_space<vmem>>, vector<1x32x8xbf16>
      %109 = vector.shape_cast %108 : vector<1x32x8xbf16> to vector<32x8xbf16>
      %cst_87 = arith.constant dense<0.000000e+00> : vector<8x8xf32>
      %110 = tpu.matmul %104, %109, %cst_87 {dimension_numbers = #tpu.dot_dimension_numbers<[1], [0], [0], [1], [0, 0, 1, 1], [], []>} : vector<8x32xbf16>, vector<32x8xbf16>, vector<8x8xf32> -> vector<8x8xf32>
      %c0_88 = arith.constant 0 : index
      %c0_89 = arith.constant 0 : index
      %c0_90 = arith.constant 0 : index
      %111 = vector.load %arg8[%c0_88, %c0_89, %c0_90] : memref<4x1x8xf32, #tpu.memory_space<vmem>>, vector<1x1x8xf32>
      %112 = vector.shape_cast %111 : vector<1x1x8xf32> to vector<1x8xf32>
      %113 = vector.broadcast %112 : vector<1x8xf32> to vector<8x8xf32>
      %114 = arith.addf %110, %113 : vector<8x8xf32>
      %c0_91 = arith.constant 0 : index
      %c0_92 = arith.constant 0 : index
      %c0_93 = arith.constant 0 : index
      %115 = vector.load %arg9[%c0_91, %c0_92, %c0_93] : memref<4x32x8xbf16, #tpu.memory_space<vmem>>, vector<1x32x8xbf16>
      %116 = vector.shape_cast %115 : vector<1x32x8xbf16> to vector<32x8xbf16>
      %cst_94 = arith.constant dense<0.000000e+00> : vector<8x8xf32>
      %117 = tpu.matmul %107, %116, %cst_94 {dimension_numbers = #tpu.dot_dimension_numbers<[1], [0], [0], [1], [0, 0, 1, 1], [], []>} : vector<8x32xbf16>, vector<32x8xbf16>, vector<8x8xf32> -> vector<8x8xf32>
      %c0_95 = arith.constant 0 : index
      %c0_96 = arith.constant 0 : index
      %c0_97 = arith.constant 0 : index
      %118 = vector.load %arg10[%c0_95, %c0_96, %c0_97] : memref<4x1x8xf32, #tpu.memory_space<vmem>>, vector<1x1x8xf32>
      %119 = vector.shape_cast %118 : vector<1x1x8xf32> to vector<1x8xf32>
      %120 = vector.broadcast %119 : vector<1x8xf32> to vector<8x8xf32>
      %121 = arith.addf %117, %120 : vector<8x8xf32>
      %122 = arith.truncf %114 : vector<8x8xf32> to vector<8x8xbf16>
      %c0_98 = arith.constant 0 : index
      %c0_99 = arith.constant 0 : index
      %c0_100 = arith.constant 0 : index
      %123 = vector.load %arg16[%c0_98, %c0_99, %c0_100] : memref<4x8x8xbf16, #tpu.memory_space<vmem>>, vector<1x8x8xbf16>
      %124 = vector.shape_cast %123 : vector<1x8x8xbf16> to vector<8x8xbf16>
      %125 = vector.shape_cast %122 : vector<8x8xbf16> to vector<1x8x8xbf16>
      tpu.vector_store %arg16[%c0_98, %c0_99, %c0_100], %125 {strides = array<i32>} : memref<4x8x8xbf16, #tpu.memory_space<vmem>>, vector<1x8x8xbf16>,
      %126 = arith.truncf %121 : vector<8x8xf32> to vector<8x8xbf16>
      %c0_101 = arith.constant 0 : index
      %c0_102 = arith.constant 0 : index
      %c0_103 = arith.constant 0 : index
      %127 = vector.load %arg17[%c0_101, %c0_102, %c0_103] : memref<4x8x8xbf16, #tpu.memory_space<vmem>>, vector<1x8x8xbf16>
      %128 = vector.shape_cast %127 : vector<1x8x8xbf16> to vector<8x8xbf16>
      %129 = vector.shape_cast %126 : vector<8x8xbf16> to vector<1x8x8xbf16>
      tpu.vector_store %arg17[%c0_101, %c0_102, %c0_103], %129 {strides = array<i32>} : memref<4x8x8xbf16, #tpu.memory_space<vmem>>, vector<1x8x8xbf16>,
      %c1_104 = arith.constant 1 : index
      %c0_105 = arith.constant 0 : index
      %c0_106 = arith.constant 0 : index
      %130 = vector.load %arg7[%c1_104, %c0_105, %c0_106] : memref<4x32x8xbf16, #tpu.memory_space<vmem>>, vector<1x32x8xbf16>
      %131 = vector.shape_cast %130 : vector<1x32x8xbf16> to vector<32x8xbf16>
      %cst_107 = arith.constant dense<0.000000e+00> : vector<8x8xf32>
      %132 = tpu.matmul %104, %131, %cst_107 {dimension_numbers = #tpu.dot_dimension_numbers<[1], [0], [0], [1], [0, 0, 1, 1], [], []>} : vector<8x32xbf16>, vector<32x8xbf16>, vector<8x8xf32> -> vector<8x8xf32>
      %c1_108 = arith.constant 1 : index
      %c0_109 = arith.constant 0 : index
      %c0_110 = arith.constant 0 : index
      %133 = vector.load %arg8[%c1_108, %c0_109, %c0_110] : memref<4x1x8xf32, #tpu.memory_space<vmem>>, vector<1x1x8xf32>
      %134 = vector.shape_cast %133 : vector<1x1x8xf32> to vector<1x8xf32>
      %135 = vector.broadcast %134 : vector<1x8xf32> to vector<8x8xf32>
      %136 = arith.addf %132, %135 : vector<8x8xf32>
      %c1_111 = arith.constant 1 : index
      %c0_112 = arith.constant 0 : index
      %c0_113 = arith.constant 0 : index
      %137 = vector.load %arg9[%c1_111, %c0_112, %c0_113] : memref<4x32x8xbf16, #tpu.memory_space<vmem>>, vector<1x32x8xbf16>
      %138 = vector.shape_cast %137 : vector<1x32x8xbf16> to vector<32x8xbf16>
      %cst_114 = arith.constant dense<0.000000e+00> : vector<8x8xf32>
      %139 = tpu.matmul %107, %138, %cst_114 {dimension_numbers = #tpu.dot_dimension_numbers<[1], [0], [0], [1], [0, 0, 1, 1], [], []>} : vector<8x32xbf16>, vector<32x8xbf16>, vector<8x8xf32> -> vector<8x8xf32>
      %c1_115 = arith.constant 1 : index
      %c0_116 = arith.constant 0 : index
      %c0_117 = arith.constant 0 : index
      %140 = vector.load %arg10[%c1_115, %c0_116, %c0_117] : memref<4x1x8xf32, #tpu.memory_space<vmem>>, vector<1x1x8xf32>
      %141 = vector.shape_cast %140 : vector<1x1x8xf32> to vector<1x8xf32>
      %142 = vector.broadcast %141 : vector<1x8xf32> to vector<8x8xf32>
      %143 = arith.addf %139, %142 : vector<8x8xf32>
      %144 = arith.truncf %136 : vector<8x8xf32> to vector<8x8xbf16>
      %c1_118 = arith.constant 1 : index
      %c0_119 = arith.constant 0 : index
      %c0_120 = arith.constant 0 : index
      %145 = vector.load %arg16[%c1_118, %c0_119, %c0_120] : memref<4x8x8xbf16, #tpu.memory_space<vmem>>, vector<1x8x8xbf16>
      %146 = vector.shape_cast %145 : vector<1x8x8xbf16> to vector<8x8xbf16>
      %147 = vector.shape_cast %144 : vector<8x8xbf16> to vector<1x8x8xbf16>
      tpu.vector_store %arg16[%c1_118, %c0_119, %c0_120], %147 {strides = array<i32>} : memref<4x8x8xbf16, #tpu.memory_space<vmem>>, vector<1x8x8xbf16>,
      %148 = arith.truncf %143 : vector<8x8xf32> to vector<8x8xbf16>
      %c1_121 = arith.constant 1 : index
      %c0_122 = arith.constant 0 : index
      %c0_123 = arith.constant 0 : index
      %149 = vector.load %arg17[%c1_121, %c0_122, %c0_123] : memref<4x8x8xbf16, #tpu.memory_space<vmem>>, vector<1x8x8xbf16>
      %150 = vector.shape_cast %149 : vector<1x8x8xbf16> to vector<8x8xbf16>
      %151 = vector.shape_cast %148 : vector<8x8xbf16> to vector<1x8x8xbf16>
      tpu.vector_store %arg17[%c1_121, %c0_122, %c0_123], %151 {strides = array<i32>} : memref<4x8x8xbf16, #tpu.memory_space<vmem>>, vector<1x8x8xbf16>,
      %c2_124 = arith.constant 2 : index
      %c0_125 = arith.constant 0 : index
      %c0_126 = arith.constant 0 : index
      %152 = vector.load %arg7[%c2_124, %c0_125, %c0_126] : memref<4x32x8xbf16, #tpu.memory_space<vmem>>, vector<1x32x8xbf16>
      %153 = vector.shape_cast %152 : vector<1x32x8xbf16> to vector<32x8xbf16>
      %cst_127 = arith.constant dense<0.000000e+00> : vector<8x8xf32>
      %154 = tpu.matmul %104, %153, %cst_127 {dimension_numbers = #tpu.dot_dimension_numbers<[1], [0], [0], [1], [0, 0, 1, 1], [], []>} : vector<8x32xbf16>, vector<32x8xbf16>, vector<8x8xf32> -> vector<8x8xf32>
      %c2_128 = arith.constant 2 : index
      %c0_129 = arith.constant 0 : index
      %c0_130 = arith.constant 0 : index
      %155 = vector.load %arg8[%c2_128, %c0_129, %c0_130] : memref<4x1x8xf32, #tpu.memory_space<vmem>>, vector<1x1x8xf32>
      %156 = vector.shape_cast %155 : vector<1x1x8xf32> to vector<1x8xf32>
      %157 = vector.broadcast %156 : vector<1x8xf32> to vector<8x8xf32>
      %158 = arith.addf %154, %157 : vector<8x8xf32>
      %c2_131 = arith.constant 2 : index
      %c0_132 = arith.constant 0 : index
      %c0_133 = arith.constant 0 : index
      %159 = vector.load %arg9[%c2_131, %c0_132, %c0_133] : memref<4x32x8xbf16, #tpu.memory_space<vmem>>, vector<1x32x8xbf16>
      %160 = vector.shape_cast %159 : vector<1x32x8xbf16> to vector<32x8xbf16>
      %cst_134 = arith.constant dense<0.000000e+00> : vector<8x8xf32>
      %161 = tpu.matmul %107, %160, %cst_134 {dimension_numbers = #tpu.dot_dimension_numbers<[1], [0], [0], [1], [0, 0, 1, 1], [], []>} : vector<8x32xbf16>, vector<32x8xbf16>, vector<8x8xf32> -> vector<8x8xf32>
      %c2_135 = arith.constant 2 : index
      %c0_136 = arith.constant 0 : index
      %c0_137 = arith.constant 0 : index
      %162 = vector.load %arg10[%c2_135, %c0_136, %c0_137] : memref<4x1x8xf32, #tpu.memory_space<vmem>>, vector<1x1x8xf32>
      %163 = vector.shape_cast %162 : vector<1x1x8xf32> to vector<1x8xf32>
      %164 = vector.broadcast %163 : vector<1x8xf32> to vector<8x8xf32>
      %165 = arith.addf %161, %164 : vector<8x8xf32>
      %166 = arith.truncf %158 : vector<8x8xf32> to vector<8x8xbf16>
      %c2_138 = arith.constant 2 : index
      %c0_139 = arith.constant 0 : index
      %c0_140 = arith.constant 0 : index
      %167 = vector.load %arg16[%c2_138, %c0_139, %c0_140] : memref<4x8x8xbf16, #tpu.memory_space<vmem>>, vector<1x8x8xbf16>
      %168 = vector.shape_cast %167 : vector<1x8x8xbf16> to vector<8x8xbf16>
      %169 = vector.shape_cast %166 : vector<8x8xbf16> to vector<1x8x8xbf16>
      tpu.vector_store %arg16[%c2_138, %c0_139, %c0_140], %169 {strides = array<i32>} : memref<4x8x8xbf16, #tpu.memory_space<vmem>>, vector<1x8x8xbf16>,
      %170 = arith.truncf %165 : vector<8x8xf32> to vector<8x8xbf16>
      %c2_141 = arith.constant 2 : index
      %c0_142 = arith.constant 0 : index
      %c0_143 = arith.constant 0 : index
      %171 = vector.load %arg17[%c2_141, %c0_142, %c0_143] : memref<4x8x8xbf16, #tpu.memory_space<vmem>>, vector<1x8x8xbf16>
      %172 = vector.shape_cast %171 : vector<1x8x8xbf16> to vector<8x8xbf16>
      %173 = vector.shape_cast %170 : vector<8x8xbf16> to vector<1x8x8xbf16>
      tpu.vector_store %arg17[%c2_141, %c0_142, %c0_143], %173 {strides = array<i32>} : memref<4x8x8xbf16, #tpu.memory_space<vmem>>, vector<1x8x8xbf16>,
      %c3_144 = arith.constant 3 : index
      %c0_145 = arith.constant 0 : index
      %c0_146 = arith.constant 0 : index
      %174 = vector.load %arg7[%c3_144, %c0_145, %c0_146] : memref<4x32x8xbf16, #tpu.memory_space<vmem>>, vector<1x32x8xbf16>
      %175 = vector.shape_cast %174 : vector<1x32x8xbf16> to vector<32x8xbf16>
      %cst_147 = arith.constant dense<0.000000e+00> : vector<8x8xf32>
      %176 = tpu.matmul %104, %175, %cst_147 {dimension_numbers = #tpu.dot_dimension_numbers<[1], [0], [0], [1], [0, 0, 1, 1], [], []>} : vector<8x32xbf16>, vector<32x8xbf16>, vector<8x8xf32> -> vector<8x8xf32>
      %c3_148 = arith.constant 3 : index
      %c0_149 = arith.constant 0 : index
      %c0_150 = arith.constant 0 : index
      %177 = vector.load %arg8[%c3_148, %c0_149, %c0_150] : memref<4x1x8xf32, #tpu.memory_space<vmem>>, vector<1x1x8xf32>
      %178 = vector.shape_cast %177 : vector<1x1x8xf32> to vector<1x8xf32>
      %179 = vector.broadcast %178 : vector<1x8xf32> to vector<8x8xf32>
      %180 = arith.addf %176, %179 : vector<8x8xf32>
      %c3_151 = arith.constant 3 : index
      %c0_152 = arith.constant 0 : index
      %c0_153 = arith.constant 0 : index
      %181 = vector.load %arg9[%c3_151, %c0_152, %c0_153] : memref<4x32x8xbf16, #tpu.memory_space<vmem>>, vector<1x32x8xbf16>
      %182 = vector.shape_cast %181 : vector<1x32x8xbf16> to vector<32x8xbf16>
      %cst_154 = arith.constant dense<0.000000e+00> : vector<8x8xf32>
      %183 = tpu.matmul %107, %182, %cst_154 {dimension_numbers = #tpu.dot_dimension_numbers<[1], [0], [0], [1], [0, 0, 1, 1], [], []>} : vector<8x32xbf16>, vector<32x8xbf16>, vector<8x8xf32> -> vector<8x8xf32>
      %c3_155 = arith.constant 3 : index
      %c0_156 = arith.constant 0 : index
      %c0_157 = arith.constant 0 : index
      %184 = vector.load %arg10[%c3_155, %c0_156, %c0_157] : memref<4x1x8xf32, #tpu.memory_space<vmem>>, vector<1x1x8xf32>
      %185 = vector.shape_cast %184 : vector<1x1x8xf32> to vector<1x8xf32>
      %186 = vector.broadcast %185 : vector<1x8xf32> to vector<8x8xf32>
      %187 = arith.addf %183, %186 : vector<8x8xf32>
      %188 = arith.truncf %180 : vector<8x8xf32> to vector<8x8xbf16>
      %c3_158 = arith.constant 3 : index
      %c0_159 = arith.constant 0 : index
      %c0_160 = arith.constant 0 : index
      %189 = vector.load %arg16[%c3_158, %c0_159, %c0_160] : memref<4x8x8xbf16, #tpu.memory_space<vmem>>, vector<1x8x8xbf16>
      %190 = vector.shape_cast %189 : vector<1x8x8xbf16> to vector<8x8xbf16>
      %191 = vector.shape_cast %188 : vector<8x8xbf16> to vector<1x8x8xbf16>
      tpu.vector_store %arg16[%c3_158, %c0_159, %c0_160], %191 {strides = array<i32>} : memref<4x8x8xbf16, #tpu.memory_space<vmem>>, vector<1x8x8xbf16>,
      %192 = arith.truncf %187 : vector<8x8xf32> to vector<8x8xbf16>
      %c3_161 = arith.constant 3 : index
      %c0_162 = arith.constant 0 : index
      %c0_163 = arith.constant 0 : index
      %193 = vector.load %arg17[%c3_161, %c0_162, %c0_163] : memref<4x8x8xbf16, #tpu.memory_space<vmem>>, vector<1x8x8xbf16>
      %194 = vector.shape_cast %193 : vector<1x8x8xbf16> to vector<8x8xbf16>
      %195 = vector.shape_cast %192 : vector<8x8xbf16> to vector<1x8x8xbf16>
      tpu.vector_store %arg17[%c3_161, %c0_162, %c0_163], %195 {strides = array<i32>} : memref<4x8x8xbf16, #tpu.memory_space<vmem>>, vector<1x8x8xbf16>,
    } else {
    }
    %c0 = arith.constant 0 : index
    %c0_1 = arith.constant 0 : index
    %c0_2 = arith.constant 0 : index
    %3 = vector.load %arg2[%c0, %c0_1, %c0_2] : memref<1x8x32xf32, #tpu.memory_space<vmem>>, vector<1x8x32xf32>
    %4 = vector.shape_cast %3 : vector<1x8x32xf32> to vector<8x32xf32>
    %5 = arith.truncf %4 : vector<8x32xf32> to vector<8x32xbf16>
    %c0_3 = arith.constant 0 : index
    %c0_4 = arith.constant 0 : index
    %c0_5 = arith.constant 0 : index
    %6 = vector.load %arg5[%c0_3, %c0_4, %c0_5] : memref<4x32x8xbf16, #tpu.memory_space<vmem>>, vector<1x32x8xbf16>
    %7 = vector.shape_cast %6 : vector<1x32x8xbf16> to vector<32x8xbf16>
    %cst = arith.constant dense<0.000000e+00> : vector<8x8xf32>
    %8 = tpu.matmul %5, %7, %cst {dimension_numbers = #tpu.dot_dimension_numbers<[1], [0], [0], [1], [0, 0, 1, 1], [], []>} : vector<8x32xbf16>, vector<32x8xbf16>, vector<8x8xf32> -> vector<8x8xf32>
    %c0_6 = arith.constant 0 : index
    %c0_7 = arith.constant 0 : index
    %c0_8 = arith.constant 0 : index
    %9 = vector.load %arg6[%c0_6, %c0_7, %c0_8] : memref<4x1x8xf32, #tpu.memory_space<vmem>>, vector<1x1x8xf32>
    %10 = vector.shape_cast %9 : vector<1x1x8xf32> to vector<1x8xf32>
    %11 = vector.broadcast %10 : vector<1x8xf32> to vector<8x8xf32>
    %12 = arith.addf %8, %11 : vector<8x8xf32>
    %13 = arith.truncf %12 : vector<8x8xf32> to vector<8x8xbf16>
    %c0_9 = arith.constant 0 : index
    %c0_10 = arith.constant 0 : index
    %c0_11 = arith.constant 0 : index
    %14 = vector.load %arg15[%c0_9, %c0_10, %c0_11] : memref<4x8x8xbf16, #tpu.memory_space<vmem>>, vector<1x8x8xbf16>
    %15 = vector.shape_cast %14 : vector<1x8x8xbf16> to vector<8x8xbf16>
    %16 = vector.shape_cast %13 : vector<8x8xbf16> to vector<1x8x8xbf16>
    tpu.vector_store %arg15[%c0_9, %c0_10, %c0_11], %16 {strides = array<i32>} : memref<4x8x8xbf16, #tpu.memory_space<vmem>>, vector<1x8x8xbf16>,
    %c1 = arith.constant 1 : index
    %c0_12 = arith.constant 0 : index
    %c0_13 = arith.constant 0 : index
    %17 = vector.load %arg5[%c1, %c0_12, %c0_13] : memref<4x32x8xbf16, #tpu.memory_space<vmem>>, vector<1x32x8xbf16>
    %18 = vector.shape_cast %17 : vector<1x32x8xbf16> to vector<32x8xbf16>
    %cst_14 = arith.constant dense<0.000000e+00> : vector<8x8xf32>
    %19 = tpu.matmul %5, %18, %cst_14 {dimension_numbers = #tpu.dot_dimension_numbers<[1], [0], [0], [1], [0, 0, 1, 1], [], []>} : vector<8x32xbf16>, vector<32x8xbf16>, vector<8x8xf32> -> vector<8x8xf32>
    %c1_15 = arith.constant 1 : index
    %c0_16 = arith.constant 0 : index
    %c0_17 = arith.constant 0 : index
    %20 = vector.load %arg6[%c1_15, %c0_16, %c0_17] : memref<4x1x8xf32, #tpu.memory_space<vmem>>, vector<1x1x8xf32>
    %21 = vector.shape_cast %20 : vector<1x1x8xf32> to vector<1x8xf32>
    %22 = vector.broadcast %21 : vector<1x8xf32> to vector<8x8xf32>
    %23 = arith.addf %19, %22 : vector<8x8xf32>
    %24 = arith.truncf %23 : vector<8x8xf32> to vector<8x8xbf16>
    %c1_18 = arith.constant 1 : index
    %c0_19 = arith.constant 0 : index
    %c0_20 = arith.constant 0 : index
    %25 = vector.load %arg15[%c1_18, %c0_19, %c0_20] : memref<4x8x8xbf16, #tpu.memory_space<vmem>>, vector<1x8x8xbf16>
    %26 = vector.shape_cast %25 : vector<1x8x8xbf16> to vector<8x8xbf16>
    %27 = vector.shape_cast %24 : vector<8x8xbf16> to vector<1x8x8xbf16>
    tpu.vector_store %arg15[%c1_18, %c0_19, %c0_20], %27 {strides = array<i32>} : memref<4x8x8xbf16, #tpu.memory_space<vmem>>, vector<1x8x8xbf16>,
    %c2 = arith.constant 2 : index
    %c0_21 = arith.constant 0 : index
    %c0_22 = arith.constant 0 : index
    %28 = vector.load %arg5[%c2, %c0_21, %c0_22] : memref<4x32x8xbf16, #tpu.memory_space<vmem>>, vector<1x32x8xbf16>
    %29 = vector.shape_cast %28 : vector<1x32x8xbf16> to vector<32x8xbf16>
    %cst_23 = arith.constant dense<0.000000e+00> : vector<8x8xf32>
    %30 = tpu.matmul %5, %29, %cst_23 {dimension_numbers = #tpu.dot_dimension_numbers<[1], [0], [0], [1], [0, 0, 1, 1], [], []>} : vector<8x32xbf16>, vector<32x8xbf16>, vector<8x8xf32> -> vector<8x8xf32>
    %c2_24 = arith.constant 2 : index
    %c0_25 = arith.constant 0 : index
    %c0_26 = arith.constant 0 : index
    %31 = vector.load %arg6[%c2_24, %c0_25, %c0_26] : memref<4x1x8xf32, #tpu.memory_space<vmem>>, vector<1x1x8xf32>
    %32 = vector.shape_cast %31 : vector<1x1x8xf32> to vector<1x8xf32>
    %33 = vector.broadcast %32 : vector<1x8xf32> to vector<8x8xf32>
    %34 = arith.addf %30, %33 : vector<8x8xf32>
    %35 = arith.truncf %34 : vector<8x8xf32> to vector<8x8xbf16>
    %c2_27 = arith.constant 2 : index
    %c0_28 = arith.constant 0 : index
    %c0_29 = arith.constant 0 : index
    %36 = vector.load %arg15[%c2_27, %c0_28, %c0_29] : memref<4x8x8xbf16, #tpu.memory_space<vmem>>, vector<1x8x8xbf16>
    %37 = vector.shape_cast %36 : vector<1x8x8xbf16> to vector<8x8xbf16>
    %38 = vector.shape_cast %35 : vector<8x8xbf16> to vector<1x8x8xbf16>
    tpu.vector_store %arg15[%c2_27, %c0_28, %c0_29], %38 {strides = array<i32>} : memref<4x8x8xbf16, #tpu.memory_space<vmem>>, vector<1x8x8xbf16>,
    %c3 = arith.constant 3 : index
    %c0_30 = arith.constant 0 : index
    %c0_31 = arith.constant 0 : index
    %39 = vector.load %arg5[%c3, %c0_30, %c0_31] : memref<4x32x8xbf16, #tpu.memory_space<vmem>>, vector<1x32x8xbf16>
    %40 = vector.shape_cast %39 : vector<1x32x8xbf16> to vector<32x8xbf16>
    %cst_32 = arith.constant dense<0.000000e+00> : vector<8x8xf32>
    %41 = tpu.matmul %5, %40, %cst_32 {dimension_numbers = #tpu.dot_dimension_numbers<[1], [0], [0], [1], [0, 0, 1, 1], [], []>} : vector<8x32xbf16>, vector<32x8xbf16>, vector<8x8xf32> -> vector<8x8xf32>
    %c3_33 = arith.constant 3 : index
    %c0_34 = arith.constant 0 : index
    %c0_35 = arith.constant 0 : index
    %42 = vector.load %arg6[%c3_33, %c0_34, %c0_35] : memref<4x1x8xf32, #tpu.memory_space<vmem>>, vector<1x1x8xf32>
    %43 = vector.shape_cast %42 : vector<1x1x8xf32> to vector<1x8xf32>
    %44 = vector.broadcast %43 : vector<1x8xf32> to vector<8x8xf32>
    %45 = arith.addf %41, %44 : vector<8x8xf32>
    %46 = arith.truncf %45 : vector<8x8xf32> to vector<8x8xbf16>
    %c3_36 = arith.constant 3 : index
    %c0_37 = arith.constant 0 : index
    %c0_38 = arith.constant 0 : index
    %47 = vector.load %arg15[%c3_36, %c0_37, %c0_38] : memref<4x8x8xbf16, #tpu.memory_space<vmem>>, vector<1x8x8xbf16>
    %48 = vector.shape_cast %47 : vector<1x8x8xbf16> to vector<8x8xbf16>
    %49 = vector.shape_cast %46 : vector<8x8xbf16> to vector<1x8x8xbf16>
    tpu.vector_store %arg15[%c3_36, %c0_37, %c0_38], %49 {strides = array<i32>} : memref<4x8x8xbf16, #tpu.memory_space<vmem>>, vector<1x8x8xbf16>,
    %c0_39 = arith.constant 0 : index
    %c0_40 = arith.constant 0 : index
    %c0_41 = arith.constant 0 : index
    %50 = vector.load %arg15[%c0_39, %c0_40, %c0_41] : memref<4x8x8xbf16, #tpu.memory_space<vmem>>, vector<4x8x8xbf16>
    %c0_42 = arith.constant 0 : index
    %c0_43 = arith.constant 0 : index
    %c0_44 = arith.constant 0 : index
    %51 = vector.load %arg16[%c0_42, %c0_43, %c0_44] : memref<4x8x8xbf16, #tpu.memory_space<vmem>>, vector<4x8x8xbf16>
    %cst_45 = arith.constant dense<0.000000e+00> : vector<4x8x8xf32>
    %52 = tpu.matmul %50, %51, %cst_45 {dimension_numbers = #tpu.dot_dimension_numbers<[2], [2], [1], [1], [0, 0, 0, 1, 1, 1], [0], [0]>} : vector<4x8x8xbf16>, vector<4x8x8xbf16>, vector<4x8x8xf32> -> vector<4x8x8xf32>
    %cst_46 = arith.constant 0.353553385 : f32
    %53 = vector.broadcast %cst_46 : f32 to vector<4x8x8xf32>
    %54 = arith.mulf %52, %53 : vector<4x8x8xf32>
    %cst_47 = arith.constant dense<0xFF800000> : vector<4x8xf32>
    %55 = vector.multi_reduction <maximumf>, %54, %cst_47 [2] : vector<4x8x8xf32> to vector<4x8xf32>
    %56 = vector.shape_cast %55 : vector<4x8xf32> to vector<4x8x1xf32>
    %57 = vector.broadcast %56 : vector<4x8x1xf32> to vector<4x8x8xf32>
    %58 = arith.subf %54, %57 : vector<4x8x8xf32>
    %59 = math.exp %58 : vector<4x8x8xf32>
    %cst_48 = arith.constant dense<0.000000e+00> : vector<4x8xf32>
    %60 = vector.multi_reduction <add>, %59, %cst_48 [2] : vector<4x8x8xf32> to vector<4x8xf32>
    %61 = vector.shape_cast %60 : vector<4x8xf32> to vector<4x8x1xf32>
    %62 = tpu.reciprocal %61 {approx = true} : vector<4x8x1xf32> -> vector<4x8x1xf32>
    %63 = vector.broadcast %62 : vector<4x8x1xf32> to vector<4x8x8xf32>
    %64 = arith.mulf %59, %63 : vector<4x8x8xf32>
    %65 = arith.truncf %64 : vector<4x8x8xf32> to vector<4x8x8xbf16>
    %c0_49 = arith.constant 0 : index
    %c0_50 = arith.constant 0 : index
    %c0_51 = arith.constant 0 : index
    %c0_52 = arith.constant 0 : index
    %66 = vector.load %arg14[%c0_49, %c0_50, %c0_51, %c0_52] : memref<1x4x8x8xbf16, #tpu.memory_space<vmem>>, vector<1x4x8x8xbf16>
    %67 = vector.shape_cast %66 : vector<1x4x8x8xbf16> to vector<4x8x8xbf16>
    %68 = vector.shape_cast %65 : vector<4x8x8xbf16> to vector<1x4x8x8xbf16>
    tpu.vector_store %arg14[%c0_49, %c0_50, %c0_51, %c0_52], %68 {strides = array<i32>} : memref<1x4x8x8xbf16, #tpu.memory_space<vmem>>, vector<1x4x8x8xbf16>,
    %69 = arith.truncf %64 : vector<4x8x8xf32> to vector<4x8x8xbf16>
    %c0_53 = arith.constant 0 : index
    %c0_54 = arith.constant 0 : index
    %c0_55 = arith.constant 0 : index
    %70 = vector.load %arg17[%c0_53, %c0_54, %c0_55] : memref<4x8x8xbf16, #tpu.memory_space<vmem>>, vector<4x8x8xbf16>
    %cst_56 = arith.constant dense<0.000000e+00> : vector<4x8x8xf32>
    %71 = tpu.matmul %69, %70, %cst_56 {dimension_numbers = #tpu.dot_dimension_numbers<[2], [1], [1], [2], [0, 0, 0, 1, 1, 2], [0], [0]>} : vector<4x8x8xbf16>, vector<4x8x8xbf16>, vector<4x8x8xf32> -> vector<4x8x8xf32>
    %72 = arith.truncf %71 : vector<4x8x8xf32> to vector<4x8x8xbf16>
    %73 = vector.extract_strided_slice %72 {offsets = [0, 0, 0], sizes = [1, 8, 8], strides = [1, 1, 1]} : vector<4x8x8xbf16> to vector<1x8x8xbf16>
    %74 = vector.shape_cast %73 : vector<1x8x8xbf16> to vector<8x8xbf16>
    %c0_57 = arith.constant 0 : index
    %c0_58 = arith.constant 0 : index
    %c0_59 = arith.constant 0 : index
    %75 = vector.load %arg11[%c0_57, %c0_58, %c0_59] : memref<4x8x32xbf16, #tpu.memory_space<vmem>>, vector<1x8x32xbf16>
    %76 = vector.shape_cast %75 : vector<1x8x32xbf16> to vector<8x32xbf16>
    %cst_60 = arith.constant dense<0.000000e+00> : vector<8x32xf32>
    %77 = tpu.matmul %74, %76, %cst_60 {dimension_numbers = #tpu.dot_dimension_numbers<[1], [0], [0], [1], [0, 0, 1, 1], [], []>} : vector<8x8xbf16>, vector<8x32xbf16>, vector<8x32xf32> -> vector<8x32xf32>
    %78 = vector.extract_strided_slice %72 {offsets = [1, 0, 0], sizes = [1, 8, 8], strides = [1, 1, 1]} : vector<4x8x8xbf16> to vector<1x8x8xbf16>
    %79 = vector.shape_cast %78 : vector<1x8x8xbf16> to vector<8x8xbf16>
    %c1_61 = arith.constant 1 : index
    %c0_62 = arith.constant 0 : index
    %c0_63 = arith.constant 0 : index
    %80 = vector.load %arg11[%c1_61, %c0_62, %c0_63] : memref<4x8x32xbf16, #tpu.memory_space<vmem>>, vector<1x8x32xbf16>
    %81 = vector.shape_cast %80 : vector<1x8x32xbf16> to vector<8x32xbf16>
    %cst_64 = arith.constant dense<0.000000e+00> : vector<8x32xf32>
    %82 = tpu.matmul %79, %81, %cst_64 {dimension_numbers = #tpu.dot_dimension_numbers<[1], [0], [0], [1], [0, 0, 1, 1], [], []>} : vector<8x8xbf16>, vector<8x32xbf16>, vector<8x32xf32> -> vector<8x32xf32>
    %83 = arith.addf %77, %82 : vector<8x32xf32>
    %84 = vector.extract_strided_slice %72 {offsets = [2, 0, 0], sizes = [1, 8, 8], strides = [1, 1, 1]} : vector<4x8x8xbf16> to vector<1x8x8xbf16>
    %85 = vector.shape_cast %84 : vector<1x8x8xbf16> to vector<8x8xbf16>
    %c2_65 = arith.constant 2 : index
    %c0_66 = arith.constant 0 : index
    %c0_67 = arith.constant 0 : index
    %86 = vector.load %arg11[%c2_65, %c0_66, %c0_67] : memref<4x8x32xbf16, #tpu.memory_space<vmem>>, vector<1x8x32xbf16>
    %87 = vector.shape_cast %86 : vector<1x8x32xbf16> to vector<8x32xbf16>
    %cst_68 = arith.constant dense<0.000000e+00> : vector<8x32xf32>
    %88 = tpu.matmul %85, %87, %cst_68 {dimension_numbers = #tpu.dot_dimension_numbers<[1], [0], [0], [1], [0, 0, 1, 1], [], []>} : vector<8x8xbf16>, vector<8x32xbf16>, vector<8x32xf32> -> vector<8x32xf32>
    %89 = arith.addf %83, %88 : vector<8x32xf32>
    %90 = vector.extract_strided_slice %72 {offsets = [3, 0, 0], sizes = [1, 8, 8], strides = [1, 1, 1]} : vector<4x8x8xbf16> to vector<1x8x8xbf16>
    %91 = vector.shape_cast %90 : vector<1x8x8xbf16> to vector<8x8xbf16>
    %c3_69 = arith.constant 3 : index
    %c0_70 = arith.constant 0 : index
    %c0_71 = arith.constant 0 : index
    %92 = vector.load %arg11[%c3_69, %c0_70, %c0_71] : memref<4x8x32xbf16, #tpu.memory_space<vmem>>, vector<1x8x32xbf16>
    %93 = vector.shape_cast %92 : vector<1x8x32xbf16> to vector<8x32xbf16>
    %cst_72 = arith.constant dense<0.000000e+00> : vector<8x32xf32>
    %94 = tpu.matmul %91, %93, %cst_72 {dimension_numbers = #tpu.dot_dimension_numbers<[1], [0], [0], [1], [0, 0, 1, 1], [], []>} : vector<8x8xbf16>, vector<8x32xbf16>, vector<8x32xf32> -> vector<8x32xf32>
    %95 = arith.addf %89, %94 : vector<8x32xf32>
    %c0_73 = arith.constant 0 : index
    %c0_74 = arith.constant 0 : index
    %96 = vector.load %arg12[%c0_73, %c0_74] : memref<1x32xf32, #tpu.memory_space<vmem>>, vector<1x32xf32>
    %97 = vector.broadcast %96 : vector<1x32xf32> to vector<8x32xf32>
    %98 = arith.addf %95, %97 : vector<8x32xf32>
    %c0_75 = arith.constant 0 : index
    %c0_76 = arith.constant 0 : index
    %c0_77 = arith.constant 0 : index
    %99 = vector.load %arg13[%c0_75, %c0_76, %c0_77] : memref<1x8x32xf32, #tpu.memory_space<vmem>>, vector<1x8x32xf32>
    %100 = vector.shape_cast %99 : vector<1x8x32xf32> to vector<8x32xf32>
    %101 = vector.shape_cast %98 : vector<8x32xf32> to vector<1x8x32xf32>
    tpu.vector_store %arg13[%c0_75, %c0_76, %c0_77], %101 {strides = array<i32>} : memref<1x8x32xf32, #tpu.memory_space<vmem>>, vector<1x8x32xf32>,
    return
  }
  func.func @transform_0(%arg0: i32, %arg1: i32) -> (i32, i32, i32) {
    %c0_i32 = arith.constant 0 : i32
    %c0_i32_0 = arith.constant 0 : i32
    return %arg0, %arg1, %c0_i32 : i32, i32, i32
  }
  func.func @transform_1(%arg0: i32, %arg1: i32) -> (i32, i32, i32) {
    %c0_i32 = arith.constant 0 : i32
    %c0_i32_0 = arith.constant 0 : i32
    %c0_i32_1 = arith.constant 0 : i32
    return %arg0, %c0_i32, %c0_i32_0 : i32, i32, i32
  }
  func.func @transform_2(%arg0: i32, %arg1: i32) -> (i32, i32, i32) {
    %c0_i32 = arith.constant 0 : i32
    %c0_i32_0 = arith.constant 0 : i32
    %c0_i32_1 = arith.constant 0 : i32
    return %arg0, %c0_i32, %c0_i32_0 : i32, i32, i32
  }
  func.func @transform_3(%arg0: i32, %arg1: i32) -> (i32, i32, i32) {
    %c0_i32 = arith.constant 0 : i32
    %c0_i32_0 = arith.constant 0 : i32
    %c0_i32_1 = arith.constant 0 : i32
    %c0_i32_2 = arith.constant 0 : i32
    return %c0_i32, %c0_i32_0, %c0_i32_1 : i32, i32, i32
  }
  func.func @transform_4(%arg0: i32, %arg1: i32) -> (i32, i32, i32) {
    %c0_i32 = arith.constant 0 : i32
    %c0_i32_0 = arith.constant 0 : i32
    %c0_i32_1 = arith.constant 0 : i32
    %c0_i32_2 = arith.constant 0 : i32
    return %c0_i32, %c0_i32_0, %c0_i32_1 : i32, i32, i32
  }
  func.func @transform_5(%arg0: i32, %arg1: i32) -> (i32, i32, i32) {
    %c0_i32 = arith.constant 0 : i32
    %c0_i32_0 = arith.constant 0 : i32
    %c0_i32_1 = arith.constant 0 : i32
    %c0_i32_2 = arith.constant 0 : i32
    return %c0_i32, %c0_i32_0, %c0_i32_1 : i32, i32, i32
  }
  func.func @transform_6(%arg0: i32, %arg1: i32) -> (i32, i32, i32) {
    %c0_i32 = arith.constant 0 : i32
    %c0_i32_0 = arith.constant 0 : i32
    %c0_i32_1 = arith.constant 0 : i32
    %c0_i32_2 = arith.constant 0 : i32
    return %c0_i32, %c0_i32_0, %c0_i32_1 : i32, i32, i32
  }
  func.func @transform_7(%arg0: i32, %arg1: i32) -> (i32, i32, i32) {
    %c0_i32 = arith.constant 0 : i32
    %c0_i32_0 = arith.constant 0 : i32
    %c0_i32_1 = arith.constant 0 : i32
    %c0_i32_2 = arith.constant 0 : i32
    return %c0_i32, %c0_i32_0, %c0_i32_1 : i32, i32, i32
  }
  func.func @transform_8(%arg0: i32, %arg1: i32) -> (i32, i32, i32) {
    %c0_i32 = arith.constant 0 : i32
    %c0_i32_0 = arith.constant 0 : i32
    %c0_i32_1 = arith.constant 0 : i32
    %c0_i32_2 = arith.constant 0 : i32
    return %c0_i32, %c0_i32_0, %c0_i32_1 : i32, i32, i32
  }
  func.func @transform_9(%arg0: i32, %arg1: i32) -> (i32, i32, i32) {
    %c0_i32 = arith.constant 0 : i32
    %c0_i32_0 = arith.constant 0 : i32
    %c0_i32_1 = arith.constant 0 : i32
    %c0_i32_2 = arith.constant 0 : i32
    return %c0_i32, %c0_i32_0, %c0_i32_1 : i32, i32, i32
  }
  func.func @transform_10(%arg0: i32, %arg1: i32) -> (i32, i32) {
    %c0_i32 = arith.constant 0 : i32
    %c0_i32_0 = arith.constant 0 : i32
    %c0_i32_1 = arith.constant 0 : i32
    return %c0_i32, %c0_i32_0 : i32, i32
  }
  func.func @transform_11(%arg0: i32, %arg1: i32) -> (i32, i32, i32) {
    %c0_i32 = arith.constant 0 : i32
    %c0_i32_0 = arith.constant 0 : i32
    return %arg0, %arg1, %c0_i32 : i32, i32, i32
  }
  func.func @transform_12(%arg0: i32, %arg1: i32) -> (i32, i32, i32, i32) {
    %c0_i32 = arith.constant 0 : i32
    %c0_i32_0 = arith.constant 0 : i32
    %c0_i32_1 = arith.constant 0 : i32
    return %arg0, %c0_i32, %arg1, %c0_i32_0 : i32, i32, i32, i32
  }
}

</mosaic_0001>

<bundles_post_ra>
// kernel: tpu_custom_call.1
= control target key start
LH: loop header
LB: loop body
LE: loop exit
PB: predicated region body
PF: predicated region fallthrough
CT: control target
= control target key end

     0   :  { %s3193_s0 = inlined_call_operand.vmem [shape: f32[2,8,32], index: 0, kind: input, shape index: {}]   ;;  %s3194_s1 = inlined_call_operand.vmem [shape: f32[2,8,32], index: 1, kind: input, shape index: {}]   ;;  %s3195_s2 = inlined_call_operand.vmem [shape: f32[2,8,32], index: 2, kind: input, shape index: {}]   ;;  %s3196_s3 = inlined_call_operand.vmem [shape: bf16[4,32,8], index: 3, kind: input, shape index: {}]   ;;  %s3197_s4 = inlined_call_operand.vmem [shape: f32[4,1,8], index: 4, kind: input, shape index: {}]   ;;  %s3198_s5 = inlined_call_operand.vmem [shape: bf16[4,32,8], index: 5, kind: input, shape index: {}]   ;;  %s3199_s6 = inlined_call_operand.vmem [shape: f32[4,1,8], index: 6, kind: input, shape index: {}]   ;;  %s3200_s7 = inlined_call_operand.vmem [shape: bf16[4,32,8], index: 7, kind: input, shape index: {}]   ;;  %s3201_s8 = inlined_call_operand.vmem [shape: f32[4,1,8], index: 8, kind: input, shape index: {}]   ;;  %s3202_s9 = inlined_call_operand.vmem [shape: bf16[4,8,32], index: 9, kind: input, shape index: {}]   ;;  %s3203_s10 = inlined_call_operand.vmem [shape: f32[1,32], index: 10, kind: input, shape index: {}]   ;;  %s3204_s11 = inlined_call_operand.hbm [shape: f32[2,8,32], index: 11, kind: output, shape index: {0}]   ;;  %s3205_s12 = inlined_call_operand.hbm [shape: bf16[2,4,8,8], index: 12, kind: output, shape index: {1}]  }
   0x1   :  { %3208 = sst [smem:[#allocation14_spill]] %s3193_s0 }
   0x2   :  { %18 = vsyncpa [#allocation6], 0 }
   0x3   :  { %20 = vsyncpa [#allocation6 + $0x1], 0 }
   0x4   :  { %21 = vsyncpa [#allocation8], 0 }
   0x5   :  { %23 = vsyncpa [#allocation8 + $0x1], 0  ;;  %s2760_s21 = smov 0   ;;  %s2762_s22 = smov 0  }
   0x6   :  { %s2764_s23 = smov 0   ;;  %s2766_s24 = smov 0  }
   0x7   :  { %s2768_s25 = smov 0   ;;  %s2770_s26 = smov 0  }
   0x8 LB: > { %3209 = sst [smem:[#allocation11_spill]] %s2683_s25  ;;  %s2122_s27 = sadd.s32 4294967295, %s2687_s26   ;;  %s2687_s26 = sphi %s2770_s26, %s29_s26   ;;  %s2683_s25 = sphi %s2768_s25, %s3218_s25   ;;  %s2679_s24 = sphi %s2766_s24, %s3217_s24   ;;  %s2675_s23 = sphi %s2764_s23, %s3221_s23   ;;  %s2671_s22 = sphi %s2762_s22, %s3220_s22   ;;  %s2667_s21 = sphi %s2760_s21, %s3219_s21  }
   0x9   : > { %s2123_s28 = sadd.s32 4294967294, %s2687_s26   ;;  %s41_s29 = sadd.s32 1, %s2683_s25 }
   0xa   : > { %s298_s30 = sadd.s32 1, %s2675_s23  ;;  %p43_p0 = scmp.ge.s32.totalorder %s41_s29, 2 }
   0xb   : > { %p308_p1 = scmp.ne.s32.totalorder %s2675_s23, %s2671_s22  ;;  %p309_p2 = scmp.eq.s32.totalorder %s2122_s27, 1 }
   0xc   : > { %p314_p3 = scmp.ne.s32.totalorder %s2671_s22, %s2667_s21  ;;  %s3223_s29 = smov (%p43_p0, %s41_s29), 0 }
   0xd   : > { %3210 = sst [smem:[#allocation12_spill]] %s3223_s29  ;;  %p2800_p4 = por %p309_p2, %p308_p1 }
   0xe   : > { %p315_p5 = scmp.eq.s32.totalorder %s2123_s28, 1  ;;  %s293_s14 = ssub.s32 %s2683_s25, %s3223_s29 }
   0xf   : > { %p2126_p6 = scmp.ge.s32.totalorder %s2687_s26, 1  ;;  %p296_p7 = scmp.eq.s32.totalorder %s293_s14, 0 }
  0x10   : > { %p2807_p8 = por %p315_p5, %p314_p3  ;;  %p409_p9 = scmp.lt.s32.totalorder %s2687_s26, 3 }
  0x11   : > { %s2813_s16 = scalar_select %p296_p7, %s2675_s23, %s298_s30  }
  0x12   : > { %p410_p10 = pnand %p2126_p6, %p409_p9 }
  0x13   : > { %3213 = sst [smem:[#allocation13_spill]] %s2813_s16  ;;  %p466_p11 = scmp.lt.s32.totalorder (!%p410_p10), %s2679_s24, 1 }
  0x14   : > { %413 = sbr.rel (%p410_p10) target bundleno = 1199 (0x4af), region = 64  ;;  %s3214_s0 = sld [smem:[#allocation14_spill]] (!%p410_p10) }
  0x15   : > { %s3050_s19 = sand.u32 (!%p410_p10), 1, %s2671_s22   ;;  %s2248_s20 = sshll.u32 (!%p410_p10), %s2679_s24, 8 }
  0x16   : > { %s3112_s27 = scalar_lea.hbm (!%p410_p10), %s3205_s12, %s2248_s20  ;;  %s2691_s14 = smov (!%p410_p10), [#allocation7]  }
  0x19   : > { %v2541_v0 = vld [vmem:[%s3198_s5 + $0x8] sm:$0xff]   ;;  %v2689_v1 = vmov 0.0   ;;  %v2543_v3 = vld [vmem:[%s3198_s5] sm:$0xff]   ;;  %vm2690_vm0 = vmmov 0   ;;  %s467_s17 = scalar_select %p466_p11, %s2679_s24, 1  ;;  %v2545_v5 = vld [vmem:[%s3198_s5 + $0x18] sm:$0xff]  }
  0x1a   : > { %2309 = vmatprep.subr.bf16.mxu0 %v2689_v1  ;;  %2317 = vmatprep.subr.bf16.mxu1 %v2689_v1  ;;  %v2542_v2 = vld [vmem:[%s3200_s7 + $0x8] sm:$0xff]   ;;  %v2544_v4 = vld [vmem:[%s3200_s7] sm:$0xff]   ;;  %v2546_v6 = vld [vmem:[%s3200_s7 + $0x18] sm:$0xff]   ;;  %vm513_vm1 = vcmask 261120   ;;  %vm624_vm2 = vcmask 60416   ;;  %vm1320_vm3 = vcmask 64512  }
  0x1b   : > { %2310 = vmatpush3.bf16.msra.mxu0 %v2541_v0  ;;  %2313 = vmatprep.mubr.msk.bf16.mxu0 %vm2690_vm0, %v2689_v1  ;;  %s2837_s18 = sshll.u32 %s467_s17, 3  ;;  %v2547_v11 = vld [vmem:[%s3198_s5 + $0x10] sm:$0xff]   ;;  %v2549_v13 = vld [vmem:[%s3198_s5 + $0x28] sm:$0xff]   ;;  %v2551_v15 = vld [vmem:[%s3198_s5 + $0x20] sm:$0xff]   ;;  %vm1568_vm4 = vcmask 1043456   ;;  %s2585_s17 = sshll.u32 %s2691_s14, 4  ;;  %s2586_s17 = int_to_ptr.vmem [resolvable:$false] %s2585_s17 }
  0x1c   : > { %2318 = vmatpush3.bf16.msra.mxu1 %v2542_v2  ;;  %2311 = vmatprep.subr.bf16.mxu0 %v2689_v1  ;;  %s476_s30 = scalar_lea.vmem %s3194_s1, %s2837_s18  ;;  %s480_s25 = scalar_lea.vmem %s3195_s2, %s2837_s18  ;;  %v2548_v12 = vld [vmem:[%s3200_s7 + $0x10] sm:$0xff]   ;;  %v2550_v14 = vld [vmem:[%s3200_s7 + $0x28] sm:$0xff]   ;;  %v2552_v16 = vld [vmem:[%s3200_s7 + $0x20] sm:$0xff]  }
  0x1d   : > { %2319 = vmatprep.subr.bf16.mxu1 %v2689_v1  ;;  %2321 = vmatprep.mubr.msk.bf16.mxu1 %vm2690_vm0, %v2689_v1  ;;  %v486_v7 = vld [vmem:[%s476_s30] sm:$0xff]  ;;  %v2553_v17 = vld [vmem:[%s3198_s5 + $0x38] sm:$0xff]   ;;  %v2555_v19 = vld [vmem:[%s3198_s5 + $0x30] sm:$0xff]   ;;  %s472_s28 = scalar_lea.vmem %s3214_s0, %s2837_s18  ;;  %s2128_s18 = sshll.u32 %s3050_s19, 4 }
  0x1e   : > { %v488_v8 = vld [vmem:[%s480_s25] sm:$0xff]  ;;  %v487_v9 = vpack.c.bf16 %v486_v7, %v486_v7  ;;  %v2554_v18 = vld [vmem:[%s3200_s7 + $0x38] sm:$0xff]   ;;  %v2556_v20 = vld [vmem:[%s3200_s7 + $0x30] sm:$0xff]   ;;  %s3055_s29 = scalar_lea.vmem [#allocation7], %s2128_s18 }
  0x1f   : > { %2312 = vmatpush3.bf16.msra.mxu0 %v2543_v3  ;;  %v489_v10 = vpack.c.bf16 %v488_v8, %v488_v8  ;;  %v2557_v21 = vld [vmem:[%s3196_s3 + $0x8] sm:$0xff]   ;;  %v2558_v22 = vld [vmem:[%s3196_s3 + $0x18] sm:$0xff]   ;;  %v2559_v23 = vld [vmem:[%s3196_s3] sm:$0xff]   ;;  %s1990_s18 = sshll.u32 %s3055_s29, 4  ;;  %s3107_s18 = int_to_ptr.vmem [resolvable:$true] %s1990_s18 }
  0x20   : > { %2320 = vmatpush3.bf16.msra.mxu1 %v2544_v4  ;;  %2325 = vmatprep.subr.bf16.mxu0 %v2689_v1  ;;  %v2560_v24 = vld [vmem:[%s3196_s3 + $0x10] sm:$0xff]   ;;  %v1036_v25 = vld [vmem:[%s472_s28] sm:$0xff]  ;;  %v2561_v27 = vld [vmem:[%s3196_s3 + $0x28] sm:$0xff]   ;;  %s2581_s30 = scalar_lea.vmem %s3107_s18, 256  ;;  %p2588_p1 = scmp.lt.s32.totalorder %s3107_s18, %s2586_s17 }
  0x21   : > { %2333 = vmatprep.subr.bf16.mxu1 %v2689_v1  ;;  %v1037_v26 = vpack.c.bf16 %v1036_v25, %v1036_v25  ;;  %v2562_v28 = vld [vmem:[%s3196_s3 + $0x38] sm:$0xff]   ;;  %v2563_v29 = vld [vmem:[%s3196_s3 + $0x20] sm:$0xff]   ;;  %v2564_v30 = vld [vmem:[%s3196_s3 + $0x30] sm:$0xff]   ;;  %p2582_p12 = scmp.ne.s32.totalorder %s3107_s18, %s2581_s30 }
  0x22   : > { %2314 = vmatmul.mubr.msk.bf16.vlgmr.msra.gmra.mxu0 %vm513_vm1, %v487_v9  ;;  %v2132_v31 = vld [vmem:[%s3199_s6] ss:$0 sm:$0xff]  ;;  %v2145_v45 = vld [vmem:[%s3199_s6 + $0x1] ss:$0 sm:$0xff]  ;;  %v2163_v61 = vld [vmem:[%s3199_s6 + $0x2] ss:$0 sm:$0xff] }
  0x23   : > { %2322 = vmatmul.mubr.msk.bf16.vlgmr.msra.gmra.mxu1 %vm513_vm1, %v489_v10  ;;  %2326 = vmatpush3.bf16.msra.mxu0 %v2545_v5  ;;  %v2136_v32 = vld [vmem:[%s3201_s8] ss:$0 sm:$0xff]  ;;  %v2154_v46 = vld [vmem:[%s3201_s8 + $0x1] ss:$0 sm:$0xff]  ;;  %v2172_v62 = vld [vmem:[%s3201_s8 + $0x2] ss:$0 sm:$0xff]  ;;  %p2583_p13 = pnand %p2582_p12, %p2800_p4 }
  0x24   : > { %2334 = vmatpush3.bf16.msra.mxu1 %v2546_v6  ;;  %2327 = vmatprep.subr.bf16.mxu0 %v2689_v1 }
  0x25   : > { %2335 = vmatprep.subr.bf16.mxu1 %v2689_v1  ;;  %2329 = vmatprep.mubr.msk.bf16.mxu0 %vm2690_vm0, %v2689_v1  ;;  %p2584_p0 = pneg %p2583_p13 }
  0x26   : > { %2337 = vmatprep.mubr.msk.bf16.mxu1 %vm2690_vm0, %v2689_v1 }
  0x27   : > { %2328 = vmatpush3.bf16.msra.mxu0 %v2547_v11 }
  0x28   : > { %2336 = vmatpush3.bf16.msra.mxu1 %v2548_v12  ;;  %2341 = vmatprep.subr.bf16.mxu0 %v2689_v1 }
  0x29   : > { %2349 = vmatprep.subr.bf16.mxu1 %v2689_v1 }
  0x2a   : > { %2330 = vmatmul.mubr.msk.bf16.vlgmr.msra.gmra.mxu0 %vm513_vm1, %v487_v9 }
  0x2b   : > { %2338 = vmatmul.mubr.msk.bf16.vlgmr.msra.gmra.mxu1 %vm513_vm1, %v489_v10  ;;  %2342 = vmatpush3.bf16.msra.mxu0 %v2549_v13 }
  0x2c   : > { %2350 = vmatpush3.bf16.msra.mxu1 %v2550_v14  ;;  %2343 = vmatprep.subr.bf16.mxu0 %v2689_v1  ;;  %v2181_v14 = vld [vmem:[%s3199_s6 + $0x3] ss:$0 sm:$0xff] }
  0x2d   : > { %2351 = vmatprep.subr.bf16.mxu1 %v2689_v1  ;;  %2345 = vmatprep.mubr.msk.bf16.mxu0 %vm2690_vm0, %v2689_v1 }
  0x2e   : > { %2353 = vmatprep.mubr.msk.bf16.mxu1 %vm2690_vm0, %v2689_v1 }
  0x2f   : > { %2344 = vmatpush3.bf16.msra.mxu0 %v2551_v15  ;;  %v2190_v15 = vld [vmem:[%s3201_s8 + $0x3] ss:$0 sm:$0xff] }
  0x30   : > { %2352 = vmatpush3.bf16.msra.mxu1 %v2552_v16  ;;  %2357 = vmatprep.subr.bf16.mxu0 %v2689_v1 }
  0x31   : > { %2365 = vmatprep.subr.bf16.mxu1 %v2689_v1 }
  0x32   : > { %2346 = vmatmul.mubr.msk.bf16.vlgmr.msra.gmra.mxu0 %vm513_vm1, %v487_v9 }
  0x33   : > { %2354 = vmatmul.mubr.msk.bf16.vlgmr.msra.gmra.mxu1 %vm513_vm1, %v489_v10  ;;  %2358 = vmatpush3.bf16.msra.mxu0 %v2553_v17 }
  0x34   : > { %2366 = vmatpush3.bf16.msra.mxu1 %v2554_v18  ;;  %2359 = vmatprep.subr.bf16.mxu0 %v2689_v1 }
  0x35   : > { %2367 = vmatprep.subr.bf16.mxu1 %v2689_v1  ;;  %2361 = vmatprep.mubr.msk.bf16.mxu0 %vm2690_vm0, %v2689_v1 }
  0x36   : > { %2369 = vmatprep.mubr.msk.bf16.mxu1 %vm2690_vm0, %v2689_v1 }
  0x37   : > { %2360 = vmatpush3.bf16.msra.mxu0 %v2555_v19 }
  0x38   : > { %2368 = vmatpush3.bf16.msra.mxu1 %v2556_v20  ;;  %2373 = vmatprep.subr.bf16.mxu0 %v2689_v1 }
  0x39   : > { %2381 = vmatprep.subr.bf16.mxu1 %v2689_v1 }
  0x3a   : > { %2362 = vmatmul.mubr.msk.bf16.vlgmr.msra.gmra.mxu0 %vm513_vm1, %v487_v9 }
  0x3b   : > { %2370 = vmatmul.mubr.msk.bf16.vlgmr.msra.gmra.mxu1 %vm513_vm1, %v489_v10  ;;  %2374 = vmatpush3.bf16.msra.mxu0 %v2557_v21 }
  0x3c   : > { %2382 = vmatpush3.bf16.msra.mxu1 %v2558_v22  ;;  %2375 = vmatprep.subr.bf16.mxu0 %v2689_v1 }
  0x3d   : > { %2383 = vmatprep.subr.bf16.mxu1 %v2689_v1  ;;  %2377 = vmatprep.mubr.msk.bf16.mxu0 %vm2690_vm0, %v2689_v1 }
  0x3e   : > { %2385 = vmatprep.mubr.msk.bf16.mxu1 %vm2690_vm0, %v2689_v1 }
  0x3f   : > { %2376 = vmatpush3.bf16.msra.mxu0 %v2559_v23 }
  0x40   : > { %2384 = vmatpush3.bf16.msra.mxu1 %v2560_v24  ;;  %2389 = vmatprep.subr.bf16.mxu0 %v2689_v1 }
  0x41   : > { %2397 = vmatprep.subr.bf16.mxu1 %v2689_v1 }
  0x42   : > { %2378 = vmatmul.mubr.msk.bf16.vlgmr.msra.gmra.mxu0 %vm513_vm1, %v1037_v26 }
  0x43   : > { %2386 = vmatmul.mubr.msk.bf16.vlgmr.msra.gmra.mxu1 %vm513_vm1, %v1037_v26  ;;  %2390 = vmatpush3.bf16.msra.mxu0 %v2561_v27 }
  0x44   : > { %2398 = vmatpush3.bf16.msra.mxu1 %v2562_v28  ;;  %2391 = vmatprep.subr.bf16.mxu0 %v2689_v1  ;;  %v2194_v28 = vld [vmem:[%s3197_s4] ss:$0 sm:$0xff] }
  0x45   : > { %2399 = vmatprep.subr.bf16.mxu1 %v2689_v1  ;;  %2393 = vmatprep.mubr.msk.bf16.mxu0 %vm2690_vm0, %v2689_v1 }
  0x46   : > { %2401 = vmatprep.mubr.msk.bf16.mxu1 %vm2690_vm0, %v2689_v1 }
  0x47   : > { %2392 = vmatpush3.bf16.msra.mxu0 %v2563_v29  ;;  %v2203_v29 = vld [vmem:[%s3197_s4 + $0x1] ss:$0 sm:$0xff] }
  0x48   : > { %2400 = vmatpush3.bf16.msra.mxu1 %v2564_v30  ;;  %2405 = vmatprep.subr.bf16.mxu0 %v2689_v1 }
  0x49   : > { %2411 = vmatprep.subr.bf16.mxu1 %v2689_v1 }
  0x4a   : > { %2394 = vmatmul.mubr.msk.bf16.vlgmr.msra.gmra.mxu0 %vm513_vm1, %v1037_v26 }
  0x4b   : > { %2402 = vmatmul.mubr.msk.bf16.vlgmr.msra.gmra.mxu1 %vm513_vm1, %v1037_v26  ;;  %2407 = vmatprep.mubr.msk.bf16.mxu0 %vm2690_vm0, %v2689_v1 }
  0x4c   : > { %2413 = vmatprep.mubr.msk.bf16.mxu1 %vm2690_vm0, %v2689_v1 }
  0xe2   : > { %v551_v33 = vpop.f32.mrf.mxu0 }
  0xe3   : > { %v617_v34 = vpop.f32.mrf.mxu1  ;;  %v552_v35 = vadd.f32 %v2132_v31, %v551_v33 }
  0xe4   : > { %v618_v36 = vadd.f32 %v2136_v32, %v617_v34  ;;  %v2315_v37 = vpop.f32.mrf.mxu0 }
  0xe5   : > { %v2323_v38 = vpop.f32.mrf.mxu1  ;;  %v623_v39 = vpack.c.bf16 %v552_v35, %v552_v35 }
  0xe6   : > { %v626_v40 = vpack.c.bf16 %v618_v36, %v618_v36  ;;  %v554_v41 = vpop.f32.mrf.mxu0 }
  0xe7   : > { %v620_v42 = vpop.f32.mrf.mxu1  ;;  %625 = vst.msk [vmem:[#allocation3] sm:$0xf] %vm624_vm2, %v623_v39 }
  0xe8   : > { %627 = vst.msk [vmem:[#allocation4] sm:$0xf] %vm624_vm2, %v626_v40  ;;  %v2316_v43 = vpop.f32.mrf.mxu0  ;;  %v2212_v42 = vld [vmem:[%s3197_s4 + $0x2] ss:$0 sm:$0xff] }
  0xe9   : > { %v2324_v44 = vpop.f32.mrf.mxu1  ;;  %v2221_v43 = vld [vmem:[%s3197_s4 + $0x3] ss:$0 sm:$0xff] }
  0xea   : > { %v687_v47 = vpop.f32.mrf.mxu0 }
  0xeb   : > { %v752_v48 = vpop.f32.mrf.mxu1  ;;  %v688_v49 = vadd.f32 %v2145_v45, %v687_v47 }
  0xec   : > { %v753_v50 = vadd.f32 %v2154_v46, %v752_v48  ;;  %v2331_v51 = vpop.f32.mrf.mxu0 }
  0xed   : > { %v2339_v52 = vpop.f32.mrf.mxu1  ;;  %v758_v53 = vpack.c.bf16 %v688_v49, %v688_v49 }
  0xee   : > { %v761_v54 = vpack.c.bf16 %v753_v50, %v753_v50  ;;  %v690_v55 = vpop.f32.mrf.mxu0  ;;  %v1316_v57 = vld [vmem:[#allocation3] sm:$0xf] }
  0xef   : > { %v755_v56 = vpop.f32.mrf.mxu1  ;;  %760 = vst.msk [vmem:[#allocation3 + $0x4] sm:$0xf] %vm624_vm2, %v758_v53  ;;  %v1325_v58 = vsel %vm1320_vm3, %v1316_v57, 0 }
  0xf0   : > { %763 = vst.msk [vmem:[#allocation4 + $0x4] sm:$0xf] %vm624_vm2, %v761_v54  ;;  %v2332_v59 = vpop.f32.mrf.mxu0  ;;  %2406 = vmatpush3.bf16.xpose.msra.mxu0 %v1325_v58 }
  0xf1   : > { %v2340_v60 = vpop.f32.mrf.mxu1  ;;  %2417 = vmatprep.subr.bf16.mxu0 %v2689_v1 }
  0xf2   : > { %v823_v63 = vpop.f32.mrf.mxu0 }
  0xf3   : > { %v888_v0 = vpop.f32.mrf.mxu1  ;;  %v824_v2 = vadd.f32 %v2163_v61, %v823_v63 }
  0xf4   : > { %v889_v3 = vadd.f32 %v2172_v62, %v888_v0  ;;  %v2347_v4 = vpop.f32.mrf.mxu0  ;;  %v1561_v62 = vld [vmem:[#allocation4] sm:$0xf] }
  0xf5   : > { %v2355_v5 = vpop.f32.mrf.mxu1  ;;  %v894_v6 = vpack.c.bf16 %v824_v2, %v824_v2 }
  0xf6   : > { %v897_v7 = vpack.c.bf16 %v889_v3, %v889_v3  ;;  %v826_v8 = vpop.f32.mrf.mxu0  ;;  %v1317_v10 = vld [vmem:[#allocation3 + $0x4] sm:$0xf]  ;;  %v1570_v3 = vsel %vm1568_vm4, %v1561_v62, 0 }
  0xf7   : > { %v891_v9 = vpop.f32.mrf.mxu1  ;;  %896 = vst.msk [vmem:[#allocation3 + $0x8] sm:$0xf] %vm624_vm2, %v894_v6  ;;  %v1371_v11 = vsel %vm1320_vm3, %v1317_v10, 0  ;;  %v1562_v63 = vld [vmem:[#allocation4 + $0x4] sm:$0xf] }
  0xf8   : > { %899 = vst.msk [vmem:[#allocation4 + $0x8] sm:$0xf] %vm624_vm2, %v897_v7  ;;  %v2348_v12 = vpop.f32.mrf.mxu0  ;;  %2412 = vmatpush3.bf16.xpose.msra.mxu1 %v1371_v11  ;;  %v1616_v4 = vsel %vm1568_vm4, %v1562_v63, 0 }
  0xf9   : > { %v2356_v13 = vpop.f32.mrf.mxu1  ;;  %2423 = vmatprep.subr.bf16.mxu1 %v2689_v1 }
  0xfa   : > { %v959_v16 = vpop.f32.mrf.mxu0 }
  0xfb   : > { %v1024_v17 = vpop.f32.mrf.mxu1  ;;  %v960_v18 = vadd.f32 %v2181_v14, %v959_v16 }
  0xfc   : > { %v1025_v19 = vadd.f32 %v2190_v15, %v1024_v17  ;;  %v2363_v20 = vpop.f32.mrf.mxu0 }
  0xfd   : > { %v2371_v21 = vpop.f32.mrf.mxu1  ;;  %v1030_v22 = vpack.c.bf16 %v960_v18, %v960_v18 }
  0xfe   : > { %v1033_v23 = vpack.c.bf16 %v1025_v19, %v1025_v19  ;;  %v962_v24 = vpop.f32.mrf.mxu0  ;;  %v1318_v50 = vld [vmem:[#allocation3 + $0x8] sm:$0xf] }
  0xff   : > { %v1027_v25 = vpop.f32.mrf.mxu1  ;;  %1032 = vst.msk [vmem:[#allocation3 + $0xc] sm:$0xf] %vm624_vm2, %v1030_v22  ;;  %v1417_v58 = vsel %vm1320_vm3, %v1318_v50, 0 }
 0x100   : > { %1035 = vst.msk [vmem:[#allocation4 + $0xc] sm:$0xf] %vm624_vm2, %v1033_v23  ;;  %v2364_v26 = vpop.f32.mrf.mxu0 }
 0x101   : > { %v2372_v27 = vpop.f32.mrf.mxu1 }
 0x102   : > { %v1099_v30 = vpop.f32.mrf.mxu0 }
 0x103   : > { %v1167_v31 = vpop.f32.mrf.mxu1  ;;  %v1100_v32 = vadd.f32 %v2194_v28, %v1099_v30 }
 0x104   : > { %v1168_v33 = vadd.f32 %v2203_v29, %v1167_v31  ;;  %v2379_v34 = vpop.f32.mrf.mxu0 }
 0x105   : > { %v2387_v35 = vpop.f32.mrf.mxu1  ;;  %v1105_v36 = vpack.c.bf16 %v1100_v32, %v1100_v32 }
 0x106   : > { %v1173_v37 = vpack.c.bf16 %v1168_v33, %v1168_v33  ;;  %v1102_v38 = vpop.f32.mrf.mxu0  ;;  %v1319_v51 = vld [vmem:[#allocation3 + $0xc] sm:$0xf] }
 0x107   : > { %v1170_v39 = vpop.f32.mrf.mxu1  ;;  %1107 = vst.msk [vmem:[#allocation2] sm:$0xf] %vm624_vm2, %v1105_v36  ;;  %v1463_v59 = vsel %vm1320_vm3, %v1319_v51, 0 }
 0x108   : > { %1175 = vst.msk [vmem:[#allocation2 + $0x4] sm:$0xf] %vm624_vm2, %v1173_v37  ;;  %v2380_v40 = vpop.f32.mrf.mxu0 }
 0x109   : > { %v2388_v41 = vpop.f32.mrf.mxu1 }
 0x10a   : > { %v1235_v44 = vpop.f32.mrf.mxu0 }
 0x10b   : > { %v1303_v45 = vpop.f32.mrf.mxu1  ;;  %v1236_v46 = vadd.f32 %v2212_v42, %v1235_v44 }
 0x10c   : > { %v1304_v47 = vadd.f32 %v2221_v43, %v1303_v45  ;;  %v2395_v48 = vpop.f32.mrf.mxu0 }
 0x10d   : > { %v2403_v49 = vpop.f32.mrf.mxu1  ;;  %v1241_v52 = vpack.c.bf16 %v1236_v46, %v1236_v46 }
 0x10e   : > { %v1309_v53 = vpack.c.bf16 %v1304_v47, %v1304_v47  ;;  %v1238_v54 = vpop.f32.mrf.mxu0  ;;  %v1312_v56 = vld [vmem:[#allocation2] sm:$0xf] }
 0x10f   : > { %v1306_v55 = vpop.f32.mrf.mxu1  ;;  %v1313_v57 = vld [vmem:[#allocation2 + $0x4] sm:$0xf]  ;;  %1243 = vst.msk [vmem:[#allocation2 + $0x8] sm:$0xf] %vm624_vm2, %v1241_v52  ;;  %2408 = vmatmul.mubr.msk.bf16.vlgmr.msra.gmra.mxu0 %vm1320_vm3, %v1312_v56 }
 0x110   : > { %1311 = vst.msk [vmem:[#allocation2 + $0xc] sm:$0xf] %vm624_vm2, %v1309_v53  ;;  %2414 = vmatmul.mubr.msk.bf16.vlgmr.msra.gmra.mxu1 %vm1320_vm3, %v1313_v57  ;;  %2418 = vmatpush3.bf16.xpose.msra.mxu0 %v1417_v58  ;;  %v2396_v60 = vpop.f32.mrf.mxu0  ;;  %v1563_v55 = vld [vmem:[#allocation4 + $0x8] sm:$0xf] }
 0x111   : > { %2424 = vmatpush3.bf16.xpose.msra.mxu1 %v1463_v59  ;;  %v2404_v61 = vpop.f32.mrf.mxu1  ;;  %2419 = vmatprep.mubr.msk.bf16.mxu0 %vm2690_vm0, %v2689_v1  ;;  %v1662_v58 = vsel %vm1568_vm4, %v1563_v55, 0  ;;  %v1564_v60 = vld [vmem:[#allocation4 + $0xc] sm:$0xf] }
 0x112   : > { %2425 = vmatprep.mubr.msk.bf16.mxu1 %vm2690_vm0, %v2689_v1  ;;  %2429 = vmatprep.subr.bf16.mxu0 %v2689_v1  ;;  %v1708_v63 = vsel %vm1568_vm4, %v1564_v60, 0 }
 0x113   : > { %2435 = vmatprep.subr.bf16.mxu1 %v2689_v1 }
 0x116   : > { %v1314_v0 = vld [vmem:[#allocation2 + $0x8] sm:$0xf] }
 0x117   : > { %v1315_v2 = vld [vmem:[#allocation2 + $0xc] sm:$0xf]  ;;  %2420 = vmatmul.mubr.msk.bf16.vlgmr.msra.gmra.mxu0 %vm1320_vm3, %v1314_v0 }
 0x118   : > { %2426 = vmatmul.mubr.msk.bf16.vlgmr.msra.gmra.mxu1 %vm1320_vm3, %v1315_v2  ;;  %2430 = vmatpush3.bf16.msra.mxu0 %v1570_v3 }
 0x119   : > { %2436 = vmatpush3.bf16.msra.mxu1 %v1616_v4  ;;  %2431 = vmatprep.mubr.msk.bf16.mxu0 %vm2690_vm0, %v2689_v1 }
 0x11a   : > { %2441 = vmatprep.subr.bf16.mxu0 %v2689_v1  ;;  %2437 = vmatprep.mubr.msk.bf16.mxu1 %vm2690_vm0, %v2689_v1 }
 0x11b   : > { %2447 = vmatprep.subr.bf16.mxu1 %v2689_v1 }
 0x1cf   : > { %v1361_v5 = vpop.f32.mrf.mxu0 }
 0x1d0   : > { %v1407_v6 = vpop.f32.mrf.mxu1  ;;  %v1505_v7 = vmul.f32 0.35355338, %v1361_v5 }
 0x1d1   : > { %v1506_v8 = vmul.f32 0.35355338, %v1407_v6  ;;  %v2409_v9 = vpop.f32.mrf.mxu0  ;;  %v1754_v6 = vld [vmem:[%s3202_s9] sm:$0xf] }
 0x1d2   : > { %v2415_v10 = vpop.f32.mrf.mxu1  ;;  %v1509_v11 = vsel %vm1320_vm3, %v1505_v7, -inf }
 0x1d3   : > { %1510 = vmax.xlane.f32.xlu0 %v1509_v11  ;;  %v1364_v13 = vpop.f32.mrf.mxu0  ;;  %v1512_v14 = vsel %vm1320_vm3, %v1506_v8, -inf  ;;  %v2238_v10 = vld [vmem:[%s3202_s9 + $0xc] sm:$0xf] }
 0x1d4   : > { %v1410_v12 = vpop.f32.mrf.mxu1  ;;  %v1904_v13 = vsel %vm1568_vm4, %v2238_v10, 0 }
 0x1d5   : > { %v2410_v15 = vpop.f32.mrf.mxu0 }
 0x1d6   : > { %v2416_v16 = vpop.f32.mrf.mxu1  ;;  %v2236_v15 = vld [vmem:[%s3202_s9 + $0x8] sm:$0xf] }
 0x1d7   : > { %1513 = vmax.xlane.f32.xlu0 %v1512_v14  ;;  %v1453_v17 = vpop.f32.mrf.mxu0 }
 0x1d8   : > { %v1499_v18 = vpop.f32.mrf.mxu1  ;;  %v1507_v19 = vmul.f32 0.35355338, %v1453_v17 }
 0x1d9   : > { %v1508_v20 = vmul.f32 0.35355338, %v1499_v18  ;;  %v2421_v21 = vpop.f32.mrf.mxu0 }
 0x1da   : > { %v2427_v22 = vpop.f32.mrf.mxu1  ;;  %v1515_v23 = vsel %vm1320_vm3, %v1507_v19, -inf }
 0x1db   : > { %1516 = vmax.xlane.f32.xlu1 %v1515_v23  ;;  %v1456_v24 = vpop.f32.mrf.mxu0  ;;  %v1518_v26 = vsel %vm1320_vm3, %v1508_v20, -inf }
 0x1dc   : > { %v1502_v25 = vpop.f32.mrf.mxu1 }
 0x1dd   : > { %v2422_v27 = vpop.f32.mrf.mxu0 }
 0x1de   : > { %v2428_v28 = vpop.f32.mrf.mxu1 }
 0x1df   : > { %1519 = vmax.xlane.f32.xlu1 %v1518_v26 }
 0x25c   : > { %v1511_v29 = vpop.xlane.xlu0 %1510 }
 0x25d   : > { %v1521_v30 = vsub.f32 %v1505_v7, %v1511_v29  ;;  %v1807_v7 = vsel %vm1568_vm4, %v1754_v6, 0 }
 0x25f   : > { %v1525_v31 = vmul.f32 1.442695, %v1521_v30 }
 0x260   : > { %v1514_v32 = vpop.xlane.xlu0 %1513 }
 0x261   : > { %2565 = vpow2.f32 %v1525_v31  ;;  %v1522_v33 = vsub.f32 %v1506_v8, %v1514_v32  ;;  %v2233_v8 = vld [vmem:[%s3202_s9 + $0x4] sm:$0xf] }
 0x262   : > { %v1761_v9 = vsel %vm1568_vm4, %v2233_v8, 0 }
 0x263   : > { %v1527_v34 = vmul.f32 1.442695, %v1522_v33 }
 0x264   : > { %v1517_v35 = vpop.xlane.xlu1 %1516 }
 0x265   : > { %2567 = vpow2.f32 %v1527_v34  ;;  %v1523_v36 = vsub.f32 %v1507_v19, %v1517_v35  ;;  %v1855_v19 = vsel %vm1568_vm4, %v2236_v15, 0 }
 0x267   : > { %v1529_v37 = vmul.f32 1.442695, %v1523_v36 }
 0x268   : > { %v1520_v38 = vpop.xlane.xlu1 %1519 }
 0x269   : > { %2569 = vpow2.f32 %v1529_v37  ;;  %v1524_v39 = vsub.f32 %v1508_v20, %v1520_v38 }
 0x26b   : > { %v1531_v40 = vmul.f32 1.442695, %v1524_v39 }
 0x26d   : > { %2571 = vpow2.f32 %v1531_v40 }
 0x26e   : > { %v2566_v41 = vpop.eup %2565 }
 0x26f   : > { %v1533_v42 = vsel %vm1320_vm3, %v2566_v41, 0.0 }
 0x270   : > { %1534 = vadd.xlane.f32.xlu0 %v1533_v42 }
 0x272   : > { %v2568_v43 = vpop.eup %2567 }
 0x273   : > { %v1536_v44 = vsel %vm1320_vm3, %v2568_v43, 0.0 }
 0x274   : > { %1537 = vadd.xlane.f32.xlu1 %v1536_v44 }
 0x276   : > { %v2570_v45 = vpop.eup %2569 }
 0x277   : > { %v1539_v46 = vsel %vm1320_vm3, %v2570_v45, 0.0 }
 0x278   : > { %1540 = vadd.xlane.f32.xlu0 %v1539_v46 }
 0x27a   : > { %v2572_v47 = vpop.eup %2571 }
 0x27b   : > { %v1542_v48 = vsel %vm1320_vm3, %v2572_v47, 0.0 }
 0x27c   : > { %1543 = vadd.xlane.f32.xlu1 %v1542_v48 }
 0x2f9   : > { %v1535_v49 = vpop.xlane.xlu0 %1534 }
 0x2fa   : > { %2573 = vrcp.f32 %v1535_v49 }
 0x2fd   : > { %v1538_v50 = vpop.xlane.xlu1 %1537 }
 0x2fe   : > { %2575 = vrcp.f32 %v1538_v50 }
 0x301   : > { %v1541_v51 = vpop.xlane.xlu0 %1540 }
 0x302   : > { %2577 = vrcp.f32 %v1541_v51 }
 0x305   : > { %v1544_v52 = vpop.xlane.xlu1 %1543 }
 0x306   : > { %2579 = vrcp.f32 %v1544_v52 }
 0x307   : > { %v2574_v53 = vpop.eup %2573 }
 0x308   : > { %v1549_v54 = vmul.f32 %v2574_v53, %v2566_v41 }
 0x30a   : > { %v1553_v56 = vpack.c.bf16 %v1549_v54, %v1549_v54 }
 0x30b   : > { %v2576_v57 = vpop.eup %2575 }
 0x30c   : > { %2432 = vmatmul.mubr.msk.bf16.vlgmr.msra.gmra.mxu0 %vm1320_vm3, %v1553_v56  ;;  %v1550_v59 = vmul.f32 %v2576_v57, %v2568_v43  ;;  %1557 = vst.msk [vmem:[%s3055_s29] sm:$0xf] %vm624_vm2, %v1553_v56 }
 0x30d   : > { %2442 = vmatpush3.bf16.msra.mxu0 %v1662_v58  ;;  %2443 = vmatprep.mubr.msk.bf16.mxu0 %vm2690_vm0, %v2689_v1 }
 0x30e   : > { %v1554_v61 = vpack.c.bf16 %v1550_v59, %v1550_v59  ;;  %2453 = vmatprep.subr.bf16.mxu0 %v2689_v1 }
 0x30f   : > { %v2578_v62 = vpop.eup %2577 }
 0x310   : > { %2438 = vmatmul.mubr.msk.bf16.vlgmr.msra.gmra.mxu1 %vm1320_vm3, %v1554_v61  ;;  %v1551_v0 = vmul.f32 %v2578_v62, %v2570_v45  ;;  %1558 = vst.msk [vmem:[%s3055_s29 + $0x4] sm:$0xf] %vm624_vm2, %v1554_v61 }
 0x311   : > { %2448 = vmatpush3.bf16.msra.mxu1 %v1708_v63  ;;  %2449 = vmatprep.mubr.msk.bf16.mxu1 %vm2690_vm0, %v2689_v1 }
 0x312   : > { %v1555_v2 = vpack.c.bf16 %v1551_v0, %v1551_v0  ;;  %2459 = vmatprep.subr.bf16.mxu1 %v2689_v1 }
 0x313   : > { %v2580_v3 = vpop.eup %2579 }
 0x314   : > { %2444 = vmatmul.mubr.msk.bf16.vlgmr.msra.gmra.mxu0 %vm1320_vm3, %v1555_v2  ;;  %v1552_v4 = vmul.f32 %v2580_v3, %v2572_v47  ;;  %1559 = vst.msk [vmem:[%s3055_s29 + $0x8] sm:$0xf] %vm624_vm2, %v1555_v2 }
 0x315   : > { %2455 = vmatprep.mubr.msk.bf16.mxu0 %vm2690_vm0, %v2689_v1  ;;  %2454 = vmatpush3.bf16.msra.mxu0 %v1761_v9 }
 0x316   : > { %v1556_v5 = vpack.c.bf16 %v1552_v4, %v1552_v4  ;;  %2465 = vmatprep.subr.bf16.mxu0 %v2689_v1 }
 0x318   : > { %2450 = vmatmul.mubr.msk.bf16.vlgmr.msra.gmra.mxu1 %vm1320_vm3, %v1556_v5  ;;  %1560 = vst.msk [vmem:[%s3055_s29 + $0xc] sm:$0xf] %vm624_vm2, %v1556_v5  ;;  %s2587_s29 = scalar_lea.vmem %s2586_s17, 512 }
 0x319   : > { %2461 = vmatprep.mubr.msk.bf16.mxu1 %vm2690_vm0, %v2689_v1  ;;  %2460 = vmatpush3.bf16.msra.mxu1 %v1807_v7  ;;  %p2589_p2 = scmp.lt.s32.totalorder %s2587_s29, %s2581_s30 }
 0x31a   : > { %2471 = vmatprep.subr.bf16.mxu1 %v2689_v1 }
 0x31b   : > { %p2590_p3 = por %p2589_p2, %p2588_p1 }
 0x31d   : > { %p2591_p5 = pnand %p2590_p3, %p2584_p0 }
 0x3cc   : > { %v1606_v11 = vpop.f32.mrf.mxu0 }
 0x3cd   : > { %v1750_v12 = vpack.c.bf16 %v1606_v11, %v1606_v11 }
 0x3ce   : > { %v2433_v14 = vpop.f32.mrf.mxu0 }
 0x3cf   : > { %2462 = vmatmul.mubr.msk.bf16.vlgmr.msra.gmra.mxu1 %vm1320_vm3, %v1750_v12 }
 0x3d0   : > { %v1609_v16 = vpop.f32.mrf.mxu0  ;;  %v1652_v17 = vpop.f32.mrf.mxu1  ;;  %2472 = vmatpush3.bf16.msra.mxu1 %v1904_v13  ;;  %2473 = vmatprep.mubr.msk.bf16.mxu1 %vm2690_vm0, %v2689_v1 }
 0x3d1   : > { %v1751_v18 = vpack.c.bf16 %v1652_v17, %v1652_v17 }
 0x3d2   : > { %v2434_v20 = vpop.f32.mrf.mxu0  ;;  %v2439_v21 = vpop.f32.mrf.mxu1 }
 0x3d3   : > { %2456 = vmatmul.mubr.msk.bf16.vlgmr.msra.gmra.mxu0 %vm1320_vm3, %v1751_v18 }
 0x3d4   : > { %v1655_v22 = vpop.f32.mrf.mxu1  ;;  %v1698_v23 = vpop.f32.mrf.mxu0  ;;  %2466 = vmatpush3.bf16.msra.mxu0 %v1855_v19  ;;  %2467 = vmatprep.mubr.msk.bf16.mxu0 %vm2690_vm0, %v2689_v1 }
 0x3d5   : > { %v1752_v28 = vpack.c.bf16 %v1698_v23, %v1698_v23 }
 0x3d6   : > { %v2440_v24 = vpop.f32.mrf.mxu1  ;;  %v2445_v25 = vpop.f32.mrf.mxu0 }
 0x3d8   : > { %v1701_v26 = vpop.f32.mrf.mxu0  ;;  %v1744_v27 = vpop.f32.mrf.mxu1 }
 0x3d9   : > { %v1753_v29 = vpack.c.bf16 %v1744_v27, %v1744_v27 }
 0x3da   : > { %v2446_v30 = vpop.f32.mrf.mxu0  ;;  %v2451_v31 = vpop.f32.mrf.mxu1 }
 0x3db   : > { %2468 = vmatmul.mubr.msk.bf16.vlgmr.msra.gmra.mxu0 %vm1320_vm3, %v1752_v28  ;;  %2474 = vmatmul.mubr.msk.bf16.vlgmr.msra.gmra.mxu1 %vm1320_vm3, %v1753_v29 }
 0x3dc   : > { %v1747_v32 = vpop.f32.mrf.mxu1 }
 0x3de   : > { %v2452_v33 = vpop.f32.mrf.mxu1 }
 0x3df   : > { %2594 = shalt.err (!%p2591_p5)
}
 0x3e0   : > { %s2595_s20 = scalar_lea.hbm %s3112_s27, 256  ;;  %s2599_s14 = scalar_lea.hbm %s3205_s12, 512 }
 0x3e1   : > { %p2596_p6 = scmp.ne.s32.totalorder %s3112_s27, %s2595_s20  ;;  %p2600_p10 = scmp.lt.s32.totalorder %s3112_s27, %s3205_s12 }
 0x3e2   : > { %p2601_p11 = scmp.lt.s32.totalorder %s2599_s14, %s2595_s20 }
 0x3e3   : > { %p2597_p7 = pnand %p2596_p6, %p2800_p4 }
 0x3e4   : > { %p2602_p12 = por %p2601_p11, %p2600_p10 }
 0x3e5   : > { %p2598_p9 = pneg %p2597_p7 }
 0x3e7   : > { %p2603_p13 = pnand %p2602_p12, %p2598_p9 }
 0x3e9   : > { %2606 = shalt.err (!%p2603_p13)
}
 0x3ea   : > { %s2692_s30 = smov 64   ;;  %s2693_s17 = smov 4   ;;  %v2240_v45 = vld [vmem:[%s3203_s10] ss:$0 sm:$0xff] }
 0x3eb   : > { %s3215_s29 = scalar_lea.sflag [#allocation8], %s3050_s19  ;;  %s2127_s0 = sshll.u32 %s3050_s19, 3 }
 0x3ec   : > { %2478 = dma.vmem_to_hbm [thread:$0]  (%p2800_p4), %s3107_s18, 256, %s3112_s27, %s3215_s29, %s2692_s30, %s2692_s30, %s2693_s17  }
 0x3ed   : > { %s2243_s18 = sshll.u32 %s2679_s24, 7  ;;  %s458_s27 = scalar_lea.vmem [#allocation5], %s2127_s0 }
 0x3ee   : > { %s1976_s16 = sshll.u32 %s458_s27, 4  ;;  %s3145_s30 = scalar_lea.hbm %s3204_s11, %s2243_s18  ;;  %s3147_s16 = int_to_ptr.vmem [resolvable:$true] %s1976_s16 }
 0x3ef   : > { %s1957_s24 = scalar_lea.sflag [#allocation6], %s3050_s19  ;;  %s2607_s17 = scalar_lea.vmem %s3147_s16, 128 }
 0x3f0   : > { %p2608_p0 = scmp.ne.s32.totalorder %s3147_s16, %s2607_s17  ;;  %s2694_s29 = smov [#allocation5]  }
 0x3f1   : > { %s2611_s0 = sshll.u32 %s2694_s29, 4  ;;  %s2612_s0 = int_to_ptr.vmem [resolvable:$false] %s2611_s0 }
 0x3f2   : > { %p2609_p1 = pnand %p2608_p0, %p2800_p4  ;;  %s2613_s28 = scalar_lea.vmem %s2612_s0, 256 }
 0x3f3   : > { %p2614_p3 = scmp.lt.s32.totalorder %s3147_s16, %s2612_s0  ;;  %p2615_p5 = scmp.lt.s32.totalorder %s2613_s28, %s2607_s17 }
 0x3f4   : > { %p2610_p2 = pneg %p2609_p1 }
 0x3f5   : > { %p2616_p6 = por %p2615_p5, %p2614_p3 }
 0x3f7   : > { %p2617_p7 = pnand %p2616_p6, %p2610_p2 }
 0x48f   : > { %v1843_v1 = vpop.f32.mrf.mxu1 }
 0x491   : > { %v2463_v34 = vpop.f32.mrf.mxu1 }
 0x493   : > { %v1797_v35 = vpop.f32.mrf.mxu0  ;;  %v1846_v36 = vpop.f32.mrf.mxu1 }
 0x494   : > { %v1844_v41 = vadd.f32 %v1843_v1, %v1797_v35 }
 0x495   : > { %v2457_v37 = vpop.f32.mrf.mxu0  ;;  %v2464_v38 = vpop.f32.mrf.mxu1 }
 0x497   : > { %v1800_v39 = vpop.f32.mrf.mxu0 }
 0x499   : > { %v2458_v40 = vpop.f32.mrf.mxu0 }
 0x49b   : > { %v1891_v42 = vpop.f32.mrf.mxu0  ;;  %v1940_v43 = vpop.f32.mrf.mxu1 }
 0x49c   : > { %v1897_v44 = vadd.f32 %v1891_v42, %v1844_v41 }
 0x49d   : > { %v2469_v46 = vpop.f32.mrf.mxu0  ;;  %v2475_v47 = vpop.f32.mrf.mxu1 }
 0x49e   : > { %v1946_v48 = vadd.f32 %v1940_v43, %v1897_v44 }
 0x49f   : > { %v1894_v49 = vpop.f32.mrf.mxu0  ;;  %v1943_v50 = vpop.f32.mrf.mxu1 }
 0x4a0   : > { %v1954_v51 = vadd.f32 %v2240_v45, %v1946_v48 }
 0x4a1   : > { %v2470_v52 = vpop.f32.mrf.mxu0  ;;  %v2476_v53 = vpop.f32.mrf.mxu1 }
 0x4a2   : > { %1955 = vst.msk [vmem:[%s458_s27] sm:$0xff] %vm513_vm1, %v1954_v51 }
 0x4a3   : > { %2620 = shalt.err (!%p2617_p7)
}
 0x4a4   : > { %s2621_s20 = scalar_lea.hbm %s3145_s30, 128  ;;  %s2625_s27 = scalar_lea.hbm %s3204_s11, 256 }
 0x4a5   : > { %p2622_p9 = scmp.ne.s32.totalorder %s3145_s30, %s2621_s20  ;;  %p2626_p12 = scmp.lt.s32.totalorder %s3145_s30, %s3204_s11 }
 0x4a6   : > { %p2627_p13 = scmp.lt.s32.totalorder %s2625_s27, %s2621_s20 }
 0x4a7   : > { %p2623_p10 = pnand %p2622_p9, %p2800_p4 }
 0x4a8   : > { %p2628_p0 = por %p2627_p13, %p2626_p12 }
 0x4a9   : > { %p2624_p11 = pneg %p2623_p10 }
 0x4ab   : > { %p2629_p1 = pnand %p2628_p0, %p2624_p11 }
 0x4ad   : > { %2632 = shalt.err (!%p2629_p1)
}
 0x4ae   : > { %2477 = dma.vmem_to_hbm [thread:$0]  (%p2800_p4), %s3147_s16, 128, %s3145_s30, %s1957_s24  }
 0x4af PF: > { %p2488_p2 = scmp.ge.s32.totalorder %s2687_s26, 2  ;;  %s2005_s17 = sand.u32 1, %s2667_s21  }
 0x4b0   : > { %s2006_s29 = scalar_lea.sflag [#allocation6], %s2005_s17 }
 0x4b1   : > { %p2482_p3 = pnand %p2488_p2, %p2807_p8 }
 0x4b3   : > { %p2483_p5 = pneg %p2482_p3 }
 0x4b5   : > { %2658 = dma.done.wait (%p2483_p5), %s2006_s29, 128  }
 0x4b6   : > { %2660 = vsyncadd (%p2483_p5), %s2006_s29, 4294967168  ;;  %s2015_s0 = scalar_lea.sflag [#allocation8], %s2005_s17 }
 0x4b7   : > { %2662 = dma.done.wait (%p2483_p5), %s2015_s0, 256  }
 0x4b8   : > { %2664 = vsyncadd (%p2483_p5), %s2015_s0, 4294967040  ;;  %s29_s26 = sadd.s32 1, %s2687_s26   ;;  %s3216_s13 = sld [smem:[#allocation13_spill]] }
 0x4b9   : > { %p26_p6 = scmp.ge.s32.totalorder %s29_s26, 4   ;;  %s3217_s24 = sld [smem:[#allocation11_spill]] }
 0x4ba   : > { %s3218_s25 = sld [smem:[#allocation12_spill]]  ;;  %s3219_s21 = smov %s2671_s22 }
 0x4bb   : > { %s3220_s22 = smov %s2675_s23  ;;  %28 = sbr.rel (!%p26_p6) target bundleno = 8 (0x8), region = 156 }
 0x4be   : > { %s3221_s23 = smov %s3216_s13 }
 0x4c0   :  { %2020 = vsyncpa [#allocation6], 1 }
 0x4c1   :  { %2022 = vsyncpa [#allocation6 + $0x1], 1 }
 0x4c2   :  { %2023 = vsyncpa [#allocation8], 1 }
 0x4c3   :  { %2025 = vsyncpa [#allocation8 + $0x1], 1 }

</bundles_post_ra>
